<compile_context>
chip_gen: v5e
topology: v5e:2x2
jax: 0.10.0
libtpu: 0.0.40
codegen_flags: <defaults>
</compile_context>

<pallas_src>
import jax
import jax.numpy as jnp
from jax import lax
from jax.experimental import pallas as pl
from jax.experimental.pallas import tpu as pltpu


# ------------------------------ VMEM budgeting -------------------------------
def _vmem_budget_bytes():
    """Per-chip scoped-VMEM budget: 3/4 of physical VMEM (128 MiB on v5e/v6e,
    64 MiB on v7x), with a 32 MiB floor if the query is unavailable."""
    phys = 64 * 1024 * 1024
    try:
        info_fn = getattr(pltpu, "get_tpu_info", None)
        if info_fn is not None:
            phys = int(getattr(info_fn(), "vmem_capacity_bytes", phys))
    except Exception:
        pass
    return max(32 * 1024 * 1024, (phys * 3) // 4)


def _pick_tile(dim, cap, align):
    """Full dim if it fits the cap, else the largest `align`-multiple <= cap that
    divides dim (keeps blocks layout-legal and the grid exact).  Falls back to
    the full dim (always legal); callers bound the footprint explicitly."""
    if dim <= cap:
        return dim
    t = (cap // align) * align
    while t >= align:
        if dim % t == 0:
            return t
        t -= align
    return dim


# ------------------------------ tiled linear ---------------------------------
def _linear_kernel(x_ref, w_ref, b_ref, o_ref, acc_ref):
    k = pl.program_id(2)

    @pl.when(k == 0)
    def _init():
        acc_ref[...] = jnp.zeros_like(acc_ref)

    acc_ref[...] += jnp.dot(x_ref[...], w_ref[...],
                            preferred_element_type=jnp.float32)

    @pl.when(k == pl.num_programs(2) - 1)
    def _finalize():
        o_ref[...] = (acc_ref[...] + b_ref[...]).astype(o_ref.dtype)


def linear(x2d, w_kn, bias_f32, out_dtype):
    """y = x2d @ w_kn + bias (w_kn already in (in, out) layout, bf16 MXU path,
    f32 accumulation, f32 bias added at finalize)."""
    M, K = x2d.shape
    K2, N = w_kn.shape
    assert K == K2 and bias_f32.shape == (N,)
    in_bytes = jnp.dtype(x2d.dtype).itemsize
    out_bytes = jnp.dtype(out_dtype).itemsize
    budget = _vmem_budget_bytes()

    tm = _pick_tile(M, 512, 16 if in_bytes == 2 else 8)
    tn = _pick_tile(N, 512, 128)
    tk = _pick_tile(K, 2048, 128)

    footprint = (2 * (tm * tk + tk * tn) * in_bytes        # double-buffered inputs
                 + 2 * tm * tn * out_bytes                 # double-buffered output
                 + tm * tn * 4 + 2 * tn * 4)               # f32 acc + bias
    if footprint > budget:
        raise ValueError(
            f"linear tiles (tm={tm}, tn={tn}, tk={tk}) exceed the VMEM budget "
            f"({footprint} > {budget} bytes); M={M}, K={K}, N={N}")

    b2 = bias_f32.reshape(1, N).astype(jnp.float32)
    # x is re-read N/tn times, w is re-read M/tm times -> honest re-streaming hint.
    bytes_accessed = (M * K * (N // tn) + K * N * (M // tm)) * in_bytes \
        + M * N * out_bytes + N * 4

    return pl.pallas_call(
        _linear_kernel,
        out_shape=jax.ShapeDtypeStruct((M, N), out_dtype),
        grid=(M // tm, N // tn, K // tk),
        in_specs=[
            pl.BlockSpec((tm, tk), lambda i, j, k: (i, k)),
            pl.BlockSpec((tk, tn), lambda i, j, k: (k, j)),
            pl.BlockSpec((1, tn), lambda i, j, k: (0, j)),
        ],
        out_specs=pl.BlockSpec((tm, tn), lambda i, j, k: (i, j)),
        scratch_shapes=[pltpu.VMEM((tm, tn), jnp.float32)],
        compiler_params=pltpu.CompilerParams(
            dimension_semantics=("parallel", "parallel", "arbitrary"),
            vmem_limit_bytes=budget),
        cost_estimate=pl.CostEstimate(
            flops=2 * M * N * K, transcendentals=0,
            bytes_accessed=bytes_accessed),
    )(x2d, w_kn, b2)


# -------------------------- flash attention kernel ---------------------------
def _attn_kernel(q_ref, k_ref, v_ref, o_ref, m_scr, l_scr, acc_scr):
    # q_ref: (tq, H, D), k_ref/v_ref: (tkv, H, D) -- slices of the (B,S,3,H,D)
    # fused QKV tensor (slot selected by the BlockSpec index_map).
    ki = pl.program_id(2)
    last = ki == pl.num_programs(2) - 1

    @pl.when(ki == 0)
    def _init():
        m_scr[...] = jnp.full_like(m_scr, -jnp.inf)
        l_scr[...] = jnp.zeros_like(l_scr)
        acc_scr[...] = jnp.zeros_like(acc_scr)

    num_heads = q_ref.shape[1]
    for h in range(num_heads):                 # static unroll over heads
        q_h = q_ref[:, h, :]                   # (tq, D)  bf16 (1/sqrt(D) pre-folded)
        k_h = k_ref[:, h, :]                   # (tkv, D) bf16
        v_h = v_ref[:, h, :]                   # (tkv, D) bf16

        s = lax.dot_general(q_h, k_h, (((1,), (1,)), ((), ())),
                            preferred_element_type=jnp.float32)   # (tq, tkv) f32

        m_prev = m_scr[h]                                         # (tq, 1)
        m_new = jnp.maximum(m_prev, s.max(axis=-1, keepdims=True))
        alpha = jnp.exp(m_prev - m_new)
        p = jnp.exp(s - m_new)                                    # f32 softmax math
        # TODO(synk): fold the row-sum into an extra ones-column of v so the MXU
        # produces l directly (saves one XLU reduction per step on v6e/v7x).
        l_scr[h] = alpha * l_scr[h] + p.sum(axis=-1, keepdims=True)
        acc_scr[h] = alpha * acc_scr[h] + lax.dot_general(
            p.astype(v_h.dtype), v_h, (((1,), (0,)), ((), ())),
            preferred_element_type=jnp.float32)                   # (tq, D)
        m_scr[h] = m_new

        @pl.when(last)
        def _finalize():
            inv_l = pl.reciprocal(l_scr[h], approx=True)          # EUP, ~free
            # Store transposed: output layout is (H, D, tq) so the reference's
            # transpose(-1,-2).view merge becomes a free reshape downstream and
            # the store is lane-dense along tq.
            o_ref[h] = (acc_scr[h] * inv_l).T.astype(o_ref.dtype)


def _attn_tiles(S, H, D, in_bytes, out_bytes, budget):
    """Pick (tq, tkv) so the per-step footprint (double-buffered q/k/v/out blocks
    + f32 scratch + f32 score temporaries) fits the per-chip VMEM budget."""
    def footprint(tq, tkv):
        qkv = 2 * (tq + 2 * tkv) * H * D * in_bytes
        out = 2 * H * D * tq * out_bytes
        scr = H * tq * (D + 2) * 4
        tmp = 3 * tq * tkv * 4
        return qkv + out + scr + tmp

    tq = _pick_tile(S, 1024, 128)
    tkv = _pick_tile(S, 512, 128)
    while footprint(tq, tkv) > budget and tkv > 128:
        nxt = _pick_tile(S, max(tkv // 2, 128), 128)
        if nxt >= tkv:
            break
        tkv = nxt
    while footprint(tq, tkv) > budget and tq > 128:
        nxt = _pick_tile(S, max(tq // 2, 128), 128)
        if nxt >= tq:
            break
        tq = nxt
    if footprint(tq, tkv) > budget:
        raise ValueError(
            f"attention tiles (tq={tq}, tkv={tkv}, H={H}, D={D}) do not fit the "
            f"VMEM budget of {budget} bytes (S={S} needs a 128-aligned divisor)")
    return tq, tkv


def attention(qkv5, out_dtype):
    """Flash attention over qkv5 of shape (B, S, 3, H, D) (fused projection
    output, free view).  Returns (B, H, D, S) so the nonstandard merge is a
    free reshape."""
    B, S, three, H, D = qkv5.shape
    assert three == 3
    in_bytes = jnp.dtype(qkv5.dtype).itemsize
    out_bytes = jnp.dtype(out_dtype).itemsize
    budget = _vmem_budget_bytes()
    tq, tkv = _attn_tiles(S, H, D, in_bytes, out_bytes, budget)

    q_spec = pl.BlockSpec((None, tq, None, H, D), lambda b, qi, ki: (b, qi, 0, 0, 0))
    k_spec = pl.BlockSpec((None, tkv, None, H, D), lambda b, qi, ki: (b, ki, 1, 0, 0))
    v_spec = pl.BlockSpec((None, tkv, None, H, D), lambda b, qi, ki: (b, ki, 2, 0, 0))
    o_spec = pl.BlockSpec((None, H, D, tq), lambda b, qi, ki: (b, 0, 0, qi))
    # TODO(synk): on v5e, if the k/v DMA shows up exposed, sweep
    # pipeline_mode=pl.Buffered(3) on k_spec/v_spec.

    flops = 4 * B * H * S * S * D
    bytes_accessed = (B * H * S * D * in_bytes * (1 + 2 * (S // tq))
                      + B * H * S * D * out_bytes)

    return pl.pallas_call(
        _attn_kernel,
        out_shape=jax.ShapeDtypeStruct((B, H, D, S), out_dtype),
        grid=(B, S // tq, S // tkv),
        in_specs=[q_spec, k_spec, v_spec],
        out_specs=o_spec,
        scratch_shapes=[
            pltpu.VMEM((H, tq, 1), jnp.float32),   # running max
            pltpu.VMEM((H, tq, 1), jnp.float32),   # running denom
            pltpu.VMEM((H, tq, D), jnp.float32),   # running output accumulator
        ],
        compiler_params=pltpu.CompilerParams(
            dimension_semantics=("parallel", "parallel", "arbitrary"),
            vmem_limit_bytes=budget),
        cost_estimate=pl.CostEstimate(
            flops=flops, transcendentals=B * H * S * S,
            bytes_accessed=bytes_accessed),
    )(qkv5, qkv5, qkv5)


# -------------------------- parameters & forward -----------------------------
def init_params(key, hidden_size):
    """nn.Linear-style init, PyTorch (out, in) weight layout."""
    bound = 1.0 / float(hidden_size) ** 0.5
    keys = jax.random.split(key, 8)

    def u(k, shape):
        return jax.random.uniform(k, shape, jnp.float32, -bound, bound)

    params = {}
    for i, name in enumerate(["q", "k", "v", "o"]):
        params[name + "_w"] = u(keys[2 * i], (hidden_size, hidden_size))
        params[name + "_b"] = u(keys[2 * i + 1], (hidden_size,))
    return params


def prepare_params(params, num_heads, compute_dtype=jnp.bfloat16):
    """One-time prep: fold 1/sqrt(D) into Q, transpose to (in, out), fuse q/k/v
    into one (K, 3*Hd) matmul, cast weights to bf16 (biases stay f32)."""
    hidden = params["q_w"].shape[0]
    head_dim = hidden // num_heads
    scale = 1.0 / float(head_dim) ** 0.5
    q_w = params["q_w"] * scale
    q_b = params["q_b"] * scale
    qkv_w = jnp.concatenate([q_w.T, params["k_w"].T, params["v_w"].T], axis=1)
    qkv_b = jnp.concatenate([q_b, params["k_b"], params["v_b"]])
    return {
        "qkv_w": qkv_w.astype(compute_dtype),
        "qkv_b": qkv_b.astype(jnp.float32),
        "o_w": params["o_w"].T.astype(compute_dtype),
        "o_b": params["o_b"].astype(jnp.float32),
    }


def multi_head_attention(prepared, hidden_state, num_heads):
    # TODO(synk): attention_mask (masked_fill) branch not implemented; this
    # reproduces the mask=None path only.
    B, S, Hd = hidden_state.shape
    D = Hd // num_heads
    compute_dtype = prepared["qkv_w"].dtype

    x2d = hidden_state.astype(compute_dtype).reshape(B * S, Hd)

    # Fused QKV projection: one pass over the activations, bf16 MXU, f32 accum.
    qkv = linear(x2d, prepared["qkv_w"], prepared["qkv_b"], compute_dtype)

    # Free view: columns are ordered (slot, head, d) by construction of qkv_w.
    qkv5 = qkv.reshape(B, S, 3, num_heads, D)

    # Flash attention; 1/sqrt(D) already folded into the Q projection.
    # Output comes back as (B, H, D, S).
    out = attention(qkv5, compute_dtype)

    # Reference's nonstandard merge `transpose(-1,-2).contiguous().view(B,-1,Hd)`
    # is now a free reshape of the (B, H, D, S) kernel output.
    out2d = out.reshape(B * S, Hd)

    y = linear(out2d, prepared["o_w"], prepared["o_b"], jnp.float32)
    return y.reshape(B, S, Hd)


# -------------------- pure-JAX reference for correctness ---------------------
def _reference(params, hidden_state, num_heads):
    B, S, Hd = hidden_state.shape
    D = Hd // num_heads
    q = hidden_state @ params["q_w"].T + params["q_b"]
    k = hidden_state @ params["k_w"].T + params["k_b"]
    v = hidden_state @ params["v_w"].T + params["v_b"]

    def split(t):
        return t.reshape(B, S, num_heads, D).transpose(0, 2, 1, 3)

    q, k, v = split(q), split(k), split(v)
    s = jnp.einsum("bhqd,bhkd->bhqk", q, k) / jnp.sqrt(jnp.float32(D))
    p = jax.nn.softmax(s, axis=-1)
    o = jnp.einsum("bhqk,bhkd->bhqd", p, v)
    o = jnp.swapaxes(o, -1, -2).reshape(B, -1, Hd)
    return o @ params["o_w"].T + params["o_b"]


if __name__ == "__main__":
    B, S, hidden_size, num_heads = 2, 8, 32, 4
    assert hidden_size % num_heads == 0
    key = jax.random.PRNGKey(0)
    pkey, xkey = jax.random.split(key)
    raw_params = init_params(pkey, hidden_size)
    prepared = prepare_params(raw_params, num_heads)   # one-time fuse/scale/cast
    x = jax.random.normal(xkey, (B, S, hidden_size), jnp.float32)

    fwd = jax.jit(multi_head_attention, static_argnums=2)
    out = jax.block_until_ready(fwd(prepared, x, num_heads))

    ref = _reference(raw_params, x, num_heads)
    assert out.shape == (B, S, hidden_size)
    # bf16 matmuls with f32 accumulation -> bf16-level tolerance vs f32 reference.
    err = float(jnp.max(jnp.abs(out - ref)))
    assert jnp.allclose(out, ref, atol=5e-2, rtol=5e-2), err
    print("KERNEL_OK")
</pallas_src>

<mosaic_0001>
module attributes {stable_mosaic.version = 11 : i64} {
  func.func @_linear_kernel(%arg0: i32, %arg1: i32, %arg2: i32, %arg3: memref<16x32xbf16, #tpu.memory_space<vmem>>, %arg4: memref<32x96xbf16, #tpu.memory_space<vmem>>, %arg5: memref<1x96xf32, #tpu.memory_space<vmem>>, %arg6: memref<16x96xbf16, #tpu.memory_space<vmem>>, %arg7: memref<16x96xf32, #tpu.memory_space<vmem>>) attributes {dimension_semantics = [#tpu.dimension_semantics<parallel>, #tpu.dimension_semantics<parallel>, #tpu.dimension_semantics<arbitrary>], iteration_bounds = array<i64: 1, 1, 1>, scalar_prefetch = 0 : i64, scratch_operands = 1 : i64, tpu.core_type = #tpu.core_type<tc>, window_params = [{transform_indices = @transform_0, window_bounds = array<i64: 16, 32>}, {transform_indices = @transform_1, window_bounds = array<i64: 32, 96>}, {transform_indices = @transform_2, window_bounds = array<i64: 1, 96>}, {transform_indices = @transform_3, window_bounds = array<i64: 16, 96>}]} {
    %c0_i32 = arith.constant 0 : i32
    %0 = arith.cmpi eq, %arg2, %c0_i32 : i32
    %1 = arith.extui %0 : i1 to i32
    %c0_i32_0 = arith.constant 0 : i32
    %2 = arith.cmpi ne, %1, %c0_i32_0 : i32
    scf.if %2 {
      %cst_10 = arith.constant 0.000000e+00 : f32
      %12 = vector.broadcast %cst_10 : f32 to vector<16x96xf32>
      %c0_11 = arith.constant 0 : index
      %c0_12 = arith.constant 0 : index
      %13 = vector.load %arg7[%c0_11, %c0_12] : memref<16x96xf32, #tpu.memory_space<vmem>>, vector<16x96xf32>
      tpu.vector_store %arg7[%c0_11, %c0_12], %12 {strides = array<i32>} : memref<16x96xf32, #tpu.memory_space<vmem>>, vector<16x96xf32>,
    } else {
    }
    %c0 = arith.constant 0 : index
    %c0_1 = arith.constant 0 : index
    %3 = vector.load %arg7[%c0, %c0_1] : memref<16x96xf32, #tpu.memory_space<vmem>>, vector<16x96xf32>
    %c0_2 = arith.constant 0 : index
    %c0_3 = arith.constant 0 : index
    %4 = vector.load %arg3[%c0_2, %c0_3] : memref<16x32xbf16, #tpu.memory_space<vmem>>, vector<16x32xbf16>
    %c0_4 = arith.constant 0 : index
    %c0_5 = arith.constant 0 : index
    %5 = vector.load %arg4[%c0_4, %c0_5] : memref<32x96xbf16, #tpu.memory_space<vmem>>, vector<32x96xbf16>
    %cst = arith.constant dense<0.000000e+00> : vector<16x96xf32>
    %6 = tpu.matmul %4, %5, %cst {dimension_numbers = #tpu.dot_dimension_numbers<[1], [0], [0], [1], [0, 0, 1, 1], [], []>} : vector<16x32xbf16>, vector<32x96xbf16>, vector<16x96xf32> -> vector<16x96xf32>
    %7 = arith.addf %3, %6 : vector<16x96xf32>
    %c0_6 = arith.constant 0 : index
    %c0_7 = arith.constant 0 : index
    %8 = vector.load %arg7[%c0_6, %c0_7] : memref<16x96xf32, #tpu.memory_space<vmem>>, vector<16x96xf32>
    tpu.vector_store %arg7[%c0_6, %c0_7], %7 {strides = array<i32>} : memref<16x96xf32, #tpu.memory_space<vmem>>, vector<16x96xf32>,
    %c0_i32_8 = arith.constant 0 : i32
    %9 = arith.cmpi eq, %arg2, %c0_i32_8 : i32
    %10 = arith.extui %9 : i1 to i32
    %c0_i32_9 = arith.constant 0 : i32
    %11 = arith.cmpi ne, %10, %c0_i32_9 : i32
    scf.if %11 {
      %c0_10 = arith.constant 0 : index
      %c0_11 = arith.constant 0 : index
      %12 = vector.load %arg7[%c0_10, %c0_11] : memref<16x96xf32, #tpu.memory_space<vmem>>, vector<16x96xf32>
      %c0_12 = arith.constant 0 : index
      %c0_13 = arith.constant 0 : index
      %13 = vector.load %arg5[%c0_12, %c0_13] : memref<1x96xf32, #tpu.memory_space<vmem>>, vector<1x96xf32>
      %14 = vector.broadcast %13 : vector<1x96xf32> to vector<16x96xf32>
      %15 = arith.addf %12, %14 : vector<16x96xf32>
      %16 = arith.truncf %15 : vector<16x96xf32> to vector<16x96xbf16>
      %c0_14 = arith.constant 0 : index
      %c0_15 = arith.constant 0 : index
      %17 = vector.load %arg6[%c0_14, %c0_15] : memref<16x96xbf16, #tpu.memory_space<vmem>>, vector<16x96xbf16>
      tpu.vector_store %arg6[%c0_14, %c0_15], %16 {strides = array<i32>} : memref<16x96xbf16, #tpu.memory_space<vmem>>, vector<16x96xbf16>,
    } else {
    }
    return
  }
  func.func @transform_0(%arg0: i32, %arg1: i32, %arg2: i32) -> (i32, i32) {
    %c0_i32 = arith.constant 0 : i32
    return %arg0, %arg2 : i32, i32
  }
  func.func @transform_1(%arg0: i32, %arg1: i32, %arg2: i32) -> (i32, i32) {
    %c0_i32 = arith.constant 0 : i32
    return %arg2, %arg1 : i32, i32
  }
  func.func @transform_2(%arg0: i32, %arg1: i32, %arg2: i32) -> (i32, i32) {
    %c0_i32 = arith.constant 0 : i32
    %c0_i32_0 = arith.constant 0 : i32
    return %c0_i32, %arg1 : i32, i32
  }
  func.func @transform_3(%arg0: i32, %arg1: i32, %arg2: i32) -> (i32, i32) {
    %c0_i32 = arith.constant 0 : i32
    return %arg0, %arg1 : i32, i32
  }
}

module attributes {stable_mosaic.version = 11 : i64} {
  func.func @_attn_kernel(%arg0: i32, %arg1: i32, %arg2: i32, %arg3: memref<1x8x1x4x8xbf16, #tpu.memory_space<vmem>>, %arg4: memref<1x8x1x4x8xbf16, #tpu.memory_space<vmem>>, %arg5: memref<1x8x1x4x8xbf16, #tpu.memory_space<vmem>>, %arg6: memref<1x4x8x8xbf16, #tpu.memory_space<vmem>>, %arg7: memref<4x8x1xf32, #tpu.memory_space<vmem>>, %arg8: memref<4x8x1xf32, #tpu.memory_space<vmem>>, %arg9: memref<4x8x8xf32, #tpu.memory_space<vmem>>) attributes {dimension_semantics = [#tpu.dimension_semantics<parallel>, #tpu.dimension_semantics<parallel>, #tpu.dimension_semantics<arbitrary>], iteration_bounds = array<i64: 2, 1, 1>, scalar_prefetch = 0 : i64, scratch_operands = 3 : i64, tpu.core_type = #tpu.core_type<tc>, window_params = [{transform_indices = @transform_0, window_bounds = array<i64: 1, 8, 1, 4, 8>}, {transform_indices = @transform_1, window_bounds = array<i64: 1, 8, 1, 4, 8>}, {transform_indices = @transform_2, window_bounds = array<i64: 1, 8, 1, 4, 8>}, {transform_indices = @transform_3, window_bounds = array<i64: 1, 4, 8, 8>}]} {
    %c0_i32 = arith.constant 0 : i32
    %0 = arith.cmpi eq, %arg2, %c0_i32 : i32
    %c0_i32_0 = arith.constant 0 : i32
    %1 = arith.cmpi eq, %arg2, %c0_i32_0 : i32
    %2 = arith.extui %1 : i1 to i32
    %c0_i32_1 = arith.constant 0 : i32
    %3 = arith.cmpi ne, %2, %c0_i32_1 : i32
    scf.if %3 {
      %cst_149 = arith.constant 0xFF800000 : f32
      %168 = vector.broadcast %cst_149 : f32 to vector<4x8x1xf32>
      %c0_150 = arith.constant 0 : index
      %c0_151 = arith.constant 0 : index
      %c0_152 = arith.constant 0 : index
      %169 = vector.load %arg7[%c0_150, %c0_151, %c0_152] : memref<4x8x1xf32, #tpu.memory_space<vmem>>, vector<4x8x1xf32>
      tpu.vector_store %arg7[%c0_150, %c0_151, %c0_152], %168 {strides = array<i32>} : memref<4x8x1xf32, #tpu.memory_space<vmem>>, vector<4x8x1xf32>,
      %cst_153 = arith.constant 0.000000e+00 : f32
      %170 = vector.broadcast %cst_153 : f32 to vector<4x8x1xf32>
      %c0_154 = arith.constant 0 : index
      %c0_155 = arith.constant 0 : index
      %c0_156 = arith.constant 0 : index
      %171 = vector.load %arg8[%c0_154, %c0_155, %c0_156] : memref<4x8x1xf32, #tpu.memory_space<vmem>>, vector<4x8x1xf32>
      tpu.vector_store %arg8[%c0_154, %c0_155, %c0_156], %170 {strides = array<i32>} : memref<4x8x1xf32, #tpu.memory_space<vmem>>, vector<4x8x1xf32>,
      %cst_157 = arith.constant 0.000000e+00 : f32
      %172 = vector.broadcast %cst_157 : f32 to vector<4x8x8xf32>
      %c0_158 = arith.constant 0 : index
      %c0_159 = arith.constant 0 : index
      %c0_160 = arith.constant 0 : index
      %173 = vector.load %arg9[%c0_158, %c0_159, %c0_160] : memref<4x8x8xf32, #tpu.memory_space<vmem>>, vector<4x8x8xf32>
      tpu.vector_store %arg9[%c0_158, %c0_159, %c0_160], %172 {strides = array<i32>} : memref<4x8x8xf32, #tpu.memory_space<vmem>>, vector<4x8x8xf32>,
    } else {
    }
    %c0 = arith.constant 0 : index
    %c0_2 = arith.constant 0 : index
    %c0_3 = arith.constant 0 : index
    %c0_4 = arith.constant 0 : index
    %c0_5 = arith.constant 0 : index
    %4 = vector.load %arg3[%c0, %c0_2, %c0_3, %c0_4, %c0_5] : memref<1x8x1x4x8xbf16, #tpu.memory_space<vmem>>, vector<1x8x1x1x8xbf16>
    %5 = vector.shape_cast %4 : vector<1x8x1x1x8xbf16> to vector<8x8xbf16>
    %c0_6 = arith.constant 0 : index
    %c0_7 = arith.constant 0 : index
    %c0_8 = arith.constant 0 : index
    %c0_9 = arith.constant 0 : index
    %c0_10 = arith.constant 0 : index
    %6 = vector.load %arg4[%c0_6, %c0_7, %c0_8, %c0_9, %c0_10] : memref<1x8x1x4x8xbf16, #tpu.memory_space<vmem>>, vector<1x8x1x1x8xbf16>
    %7 = vector.shape_cast %6 : vector<1x8x1x1x8xbf16> to vector<8x8xbf16>
    %c0_11 = arith.constant 0 : index
    %c0_12 = arith.constant 0 : index
    %c0_13 = arith.constant 0 : index
    %c0_14 = arith.constant 0 : index
    %c0_15 = arith.constant 0 : index
    %8 = vector.load %arg5[%c0_11, %c0_12, %c0_13, %c0_14, %c0_15] : memref<1x8x1x4x8xbf16, #tpu.memory_space<vmem>>, vector<1x8x1x1x8xbf16>
    %9 = vector.shape_cast %8 : vector<1x8x1x1x8xbf16> to vector<8x8xbf16>
    %cst = arith.constant dense<0.000000e+00> : vector<8x8xf32>
    %10 = tpu.matmul %5, %7, %cst {dimension_numbers = #tpu.dot_dimension_numbers<[1], [1], [0], [0], [0, 0, 1, 0], [], []>} : vector<8x8xbf16>, vector<8x8xbf16>, vector<8x8xf32> -> vector<8x8xf32>
    %c0_16 = arith.constant 0 : index
    %c0_17 = arith.constant 0 : index
    %c0_18 = arith.constant 0 : index
    %11 = vector.load %arg7[%c0_16, %c0_17, %c0_18] : memref<4x8x1xf32, #tpu.memory_space<vmem>>, vector<1x8x1xf32>
    %12 = vector.shape_cast %11 : vector<1x8x1xf32> to vector<8x1xf32>
    %cst_19 = arith.constant dense<0xFF800000> : vector<8xf32>
    %13 = vector.multi_reduction <maximumf>, %10, %cst_19 [1] : vector<8x8xf32> to vector<8xf32>
    %14 = vector.shape_cast %13 : vector<8xf32> to vector<8x1xf32>
    %15 = arith.maximumf %12, %14 : vector<8x1xf32>
    %16 = arith.subf %12, %15 : vector<8x1xf32>
    %17 = math.exp %16 : vector<8x1xf32>
    %18 = vector.broadcast %15 : vector<8x1xf32> to vector<8x8xf32>
    %19 = arith.subf %10, %18 : vector<8x8xf32>
    %20 = math.exp %19 : vector<8x8xf32>
    %c0_20 = arith.constant 0 : index
    %c0_21 = arith.constant 0 : index
    %c0_22 = arith.constant 0 : index
    %21 = vector.load %arg8[%c0_20, %c0_21, %c0_22] : memref<4x8x1xf32, #tpu.memory_space<vmem>>, vector<1x8x1xf32>
    %22 = vector.shape_cast %21 : vector<1x8x1xf32> to vector<8x1xf32>
    %23 = arith.mulf %17, %22 : vector<8x1xf32>
    %cst_23 = arith.constant dense<0.000000e+00> : vector<8xf32>
    %24 = vector.multi_reduction <add>, %20, %cst_23 [1] : vector<8x8xf32> to vector<8xf32>
    %25 = vector.shape_cast %24 : vector<8xf32> to vector<8x1xf32>
    %26 = arith.addf %23, %25 : vector<8x1xf32>
    %c0_24 = arith.constant 0 : index
    %c0_25 = arith.constant 0 : index
    %c0_26 = arith.constant 0 : index
    %27 = vector.load %arg8[%c0_24, %c0_25, %c0_26] : memref<4x8x1xf32, #tpu.memory_space<vmem>>, vector<1x8x1xf32>
    %28 = vector.shape_cast %27 : vector<1x8x1xf32> to vector<8x1xf32>
    %29 = vector.shape_cast %26 : vector<8x1xf32> to vector<1x8x1xf32>
    tpu.vector_store %arg8[%c0_24, %c0_25, %c0_26], %29 {strides = array<i32>} : memref<4x8x1xf32, #tpu.memory_space<vmem>>, vector<1x8x1xf32>,
    %c0_27 = arith.constant 0 : index
    %c0_28 = arith.constant 0 : index
    %c0_29 = arith.constant 0 : index
    %30 = vector.load %arg9[%c0_27, %c0_28, %c0_29] : memref<4x8x8xf32, #tpu.memory_space<vmem>>, vector<1x8x8xf32>
    %31 = vector.shape_cast %30 : vector<1x8x8xf32> to vector<8x8xf32>
    %32 = vector.broadcast %17 : vector<8x1xf32> to vector<8x8xf32>
    %33 = arith.mulf %32, %31 : vector<8x8xf32>
    %34 = arith.truncf %20 : vector<8x8xf32> to vector<8x8xbf16>
    %cst_30 = arith.constant dense<0.000000e+00> : vector<8x8xf32>
    %35 = tpu.matmul %34, %9, %cst_30 {dimension_numbers = #tpu.dot_dimension_numbers<[1], [0], [0], [1], [0, 0, 1, 1], [], []>} : vector<8x8xbf16>, vector<8x8xbf16>, vector<8x8xf32> -> vector<8x8xf32>
    %36 = arith.addf %33, %35 : vector<8x8xf32>
    %c0_31 = arith.constant 0 : index
    %c0_32 = arith.constant 0 : index
    %c0_33 = arith.constant 0 : index
    %37 = vector.load %arg9[%c0_31, %c0_32, %c0_33] : memref<4x8x8xf32, #tpu.memory_space<vmem>>, vector<1x8x8xf32>
    %38 = vector.shape_cast %37 : vector<1x8x8xf32> to vector<8x8xf32>
    %39 = vector.shape_cast %36 : vector<8x8xf32> to vector<1x8x8xf32>
    tpu.vector_store %arg9[%c0_31, %c0_32, %c0_33], %39 {strides = array<i32>} : memref<4x8x8xf32, #tpu.memory_space<vmem>>, vector<1x8x8xf32>,
    %c0_34 = arith.constant 0 : index
    %c0_35 = arith.constant 0 : index
    %c0_36 = arith.constant 0 : index
    %40 = vector.load %arg7[%c0_34, %c0_35, %c0_36] : memref<4x8x1xf32, #tpu.memory_space<vmem>>, vector<1x8x1xf32>
    %41 = vector.shape_cast %40 : vector<1x8x1xf32> to vector<8x1xf32>
    %42 = vector.shape_cast %15 : vector<8x1xf32> to vector<1x8x1xf32>
    tpu.vector_store %arg7[%c0_34, %c0_35, %c0_36], %42 {strides = array<i32>} : memref<4x8x1xf32, #tpu.memory_space<vmem>>, vector<1x8x1xf32>,
    %43 = arith.extui %0 : i1 to i32
    %c0_i32_37 = arith.constant 0 : i32
    %44 = arith.cmpi ne, %43, %c0_i32_37 : i32
    scf.if %44 {
      %c0_149 = arith.constant 0 : index
      %c0_150 = arith.constant 0 : index
      %c0_151 = arith.constant 0 : index
      %168 = vector.load %arg8[%c0_149, %c0_150, %c0_151] : memref<4x8x1xf32, #tpu.memory_space<vmem>>, vector<1x8x1xf32>
      %169 = vector.shape_cast %168 : vector<1x8x1xf32> to vector<8x1xf32>
      %170 = tpu.reciprocal %169 {approx = true} : vector<8x1xf32> -> vector<8x1xf32>
      %c0_152 = arith.constant 0 : index
      %c0_153 = arith.constant 0 : index
      %c0_154 = arith.constant 0 : index
      %171 = vector.load %arg9[%c0_152, %c0_153, %c0_154] : memref<4x8x8xf32, #tpu.memory_space<vmem>>, vector<1x8x8xf32>
      %172 = vector.shape_cast %171 : vector<1x8x8xf32> to vector<8x8xf32>
      %173 = vector.broadcast %170 : vector<8x1xf32> to vector<8x8xf32>
      %174 = arith.mulf %172, %173 : vector<8x8xf32>
      %175 = tpu.transpose %174, [1, 0] : vector<8x8xf32> -> vector<8x8xf32>
      %176 = arith.truncf %175 : vector<8x8xf32> to vector<8x8xbf16>
      %c0_155 = arith.constant 0 : index
      %c0_156 = arith.constant 0 : index
      %c0_157 = arith.constant 0 : index
      %c0_158 = arith.constant 0 : index
      %177 = vector.load %arg6[%c0_155, %c0_156, %c0_157, %c0_158] : memref<1x4x8x8xbf16, #tpu.memory_space<vmem>>, vector<1x1x8x8xbf16>
      %178 = vector.shape_cast %177 : vector<1x1x8x8xbf16> to vector<8x8xbf16>
      %179 = vector.shape_cast %176 : vector<8x8xbf16> to vector<1x1x8x8xbf16>
      tpu.vector_store %arg6[%c0_155, %c0_156, %c0_157, %c0_158], %179 {strides = array<i32>} : memref<1x4x8x8xbf16, #tpu.memory_space<vmem>>, vector<1x1x8x8xbf16>,
    } else {
    }
    %c0_38 = arith.constant 0 : index
    %c0_39 = arith.constant 0 : index
    %c0_40 = arith.constant 0 : index
    %c1 = arith.constant 1 : index
    %c0_41 = arith.constant 0 : index
    %45 = vector.load %arg3[%c0_38, %c0_39, %c0_40, %c1, %c0_41] : memref<1x8x1x4x8xbf16, #tpu.memory_space<vmem>>, vector<1x8x1x1x8xbf16>
    %46 = vector.shape_cast %45 : vector<1x8x1x1x8xbf16> to vector<8x8xbf16>
    %c0_42 = arith.constant 0 : index
    %c0_43 = arith.constant 0 : index
    %c0_44 = arith.constant 0 : index
    %c1_45 = arith.constant 1 : index
    %c0_46 = arith.constant 0 : index
    %47 = vector.load %arg4[%c0_42, %c0_43, %c0_44, %c1_45, %c0_46] : memref<1x8x1x4x8xbf16, #tpu.memory_space<vmem>>, vector<1x8x1x1x8xbf16>
    %48 = vector.shape_cast %47 : vector<1x8x1x1x8xbf16> to vector<8x8xbf16>
    %c0_47 = arith.constant 0 : index
    %c0_48 = arith.constant 0 : index
    %c0_49 = arith.constant 0 : index
    %c1_50 = arith.constant 1 : index
    %c0_51 = arith.constant 0 : index
    %49 = vector.load %arg5[%c0_47, %c0_48, %c0_49, %c1_50, %c0_51] : memref<1x8x1x4x8xbf16, #tpu.memory_space<vmem>>, vector<1x8x1x1x8xbf16>
    %50 = vector.shape_cast %49 : vector<1x8x1x1x8xbf16> to vector<8x8xbf16>
    %cst_52 = arith.constant dense<0.000000e+00> : vector<8x8xf32>
    %51 = tpu.matmul %46, %48, %cst_52 {dimension_numbers = #tpu.dot_dimension_numbers<[1], [1], [0], [0], [0, 0, 1, 0], [], []>} : vector<8x8xbf16>, vector<8x8xbf16>, vector<8x8xf32> -> vector<8x8xf32>
    %c1_53 = arith.constant 1 : index
    %c0_54 = arith.constant 0 : index
    %c0_55 = arith.constant 0 : index
    %52 = vector.load %arg7[%c1_53, %c0_54, %c0_55] : memref<4x8x1xf32, #tpu.memory_space<vmem>>, vector<1x8x1xf32>
    %53 = vector.shape_cast %52 : vector<1x8x1xf32> to vector<8x1xf32>
    %cst_56 = arith.constant dense<0xFF800000> : vector<8xf32>
    %54 = vector.multi_reduction <maximumf>, %51, %cst_56 [1] : vector<8x8xf32> to vector<8xf32>
    %55 = vector.shape_cast %54 : vector<8xf32> to vector<8x1xf32>
    %56 = arith.maximumf %53, %55 : vector<8x1xf32>
    %57 = arith.subf %53, %56 : vector<8x1xf32>
    %58 = math.exp %57 : vector<8x1xf32>
    %59 = vector.broadcast %56 : vector<8x1xf32> to vector<8x8xf32>
    %60 = arith.subf %51, %59 : vector<8x8xf32>
    %61 = math.exp %60 : vector<8x8xf32>
    %c1_57 = arith.constant 1 : index
    %c0_58 = arith.constant 0 : index
    %c0_59 = arith.constant 0 : index
    %62 = vector.load %arg8[%c1_57, %c0_58, %c0_59] : memref<4x8x1xf32, #tpu.memory_space<vmem>>, vector<1x8x1xf32>
    %63 = vector.shape_cast %62 : vector<1x8x1xf32> to vector<8x1xf32>
    %64 = arith.mulf %58, %63 : vector<8x1xf32>
    %cst_60 = arith.constant dense<0.000000e+00> : vector<8xf32>
    %65 = vector.multi_reduction <add>, %61, %cst_60 [1] : vector<8x8xf32> to vector<8xf32>
    %66 = vector.shape_cast %65 : vector<8xf32> to vector<8x1xf32>
    %67 = arith.addf %64, %66 : vector<8x1xf32>
    %c1_61 = arith.constant 1 : index
    %c0_62 = arith.constant 0 : index
    %c0_63 = arith.constant 0 : index
    %68 = vector.load %arg8[%c1_61, %c0_62, %c0_63] : memref<4x8x1xf32, #tpu.memory_space<vmem>>, vector<1x8x1xf32>
    %69 = vector.shape_cast %68 : vector<1x8x1xf32> to vector<8x1xf32>
    %70 = vector.shape_cast %67 : vector<8x1xf32> to vector<1x8x1xf32>
    tpu.vector_store %arg8[%c1_61, %c0_62, %c0_63], %70 {strides = array<i32>} : memref<4x8x1xf32, #tpu.memory_space<vmem>>, vector<1x8x1xf32>,
    %c1_64 = arith.constant 1 : index
    %c0_65 = arith.constant 0 : index
    %c0_66 = arith.constant 0 : index
    %71 = vector.load %arg9[%c1_64, %c0_65, %c0_66] : memref<4x8x8xf32, #tpu.memory_space<vmem>>, vector<1x8x8xf32>
    %72 = vector.shape_cast %71 : vector<1x8x8xf32> to vector<8x8xf32>
    %73 = vector.broadcast %58 : vector<8x1xf32> to vector<8x8xf32>
    %74 = arith.mulf %73, %72 : vector<8x8xf32>
    %75 = arith.truncf %61 : vector<8x8xf32> to vector<8x8xbf16>
    %cst_67 = arith.constant dense<0.000000e+00> : vector<8x8xf32>
    %76 = tpu.matmul %75, %50, %cst_67 {dimension_numbers = #tpu.dot_dimension_numbers<[1], [0], [0], [1], [0, 0, 1, 1], [], []>} : vector<8x8xbf16>, vector<8x8xbf16>, vector<8x8xf32> -> vector<8x8xf32>
    %77 = arith.addf %74, %76 : vector<8x8xf32>
    %c1_68 = arith.constant 1 : index
    %c0_69 = arith.constant 0 : index
    %c0_70 = arith.constant 0 : index
    %78 = vector.load %arg9[%c1_68, %c0_69, %c0_70] : memref<4x8x8xf32, #tpu.memory_space<vmem>>, vector<1x8x8xf32>
    %79 = vector.shape_cast %78 : vector<1x8x8xf32> to vector<8x8xf32>
    %80 = vector.shape_cast %77 : vector<8x8xf32> to vector<1x8x8xf32>
    tpu.vector_store %arg9[%c1_68, %c0_69, %c0_70], %80 {strides = array<i32>} : memref<4x8x8xf32, #tpu.memory_space<vmem>>, vector<1x8x8xf32>,
    %c1_71 = arith.constant 1 : index
    %c0_72 = arith.constant 0 : index
    %c0_73 = arith.constant 0 : index
    %81 = vector.load %arg7[%c1_71, %c0_72, %c0_73] : memref<4x8x1xf32, #tpu.memory_space<vmem>>, vector<1x8x1xf32>
    %82 = vector.shape_cast %81 : vector<1x8x1xf32> to vector<8x1xf32>
    %83 = vector.shape_cast %56 : vector<8x1xf32> to vector<1x8x1xf32>
    tpu.vector_store %arg7[%c1_71, %c0_72, %c0_73], %83 {strides = array<i32>} : memref<4x8x1xf32, #tpu.memory_space<vmem>>, vector<1x8x1xf32>,
    %84 = arith.extui %0 : i1 to i32
    %c0_i32_74 = arith.constant 0 : i32
    %85 = arith.cmpi ne, %84, %c0_i32_74 : i32
    scf.if %85 {
      %c1_149 = arith.constant 1 : index
      %c0_150 = arith.constant 0 : index
      %c0_151 = arith.constant 0 : index
      %168 = vector.load %arg8[%c1_149, %c0_150, %c0_151] : memref<4x8x1xf32, #tpu.memory_space<vmem>>, vector<1x8x1xf32>
      %169 = vector.shape_cast %168 : vector<1x8x1xf32> to vector<8x1xf32>
      %170 = tpu.reciprocal %169 {approx = true} : vector<8x1xf32> -> vector<8x1xf32>
      %c1_152 = arith.constant 1 : index
      %c0_153 = arith.constant 0 : index
      %c0_154 = arith.constant 0 : index
      %171 = vector.load %arg9[%c1_152, %c0_153, %c0_154] : memref<4x8x8xf32, #tpu.memory_space<vmem>>, vector<1x8x8xf32>
      %172 = vector.shape_cast %171 : vector<1x8x8xf32> to vector<8x8xf32>
      %173 = vector.broadcast %170 : vector<8x1xf32> to vector<8x8xf32>
      %174 = arith.mulf %172, %173 : vector<8x8xf32>
      %175 = tpu.transpose %174, [1, 0] : vector<8x8xf32> -> vector<8x8xf32>
      %176 = arith.truncf %175 : vector<8x8xf32> to vector<8x8xbf16>
      %c0_155 = arith.constant 0 : index
      %c1_156 = arith.constant 1 : index
      %c0_157 = arith.constant 0 : index
      %c0_158 = arith.constant 0 : index
      %177 = vector.load %arg6[%c0_155, %c1_156, %c0_157, %c0_158] : memref<1x4x8x8xbf16, #tpu.memory_space<vmem>>, vector<1x1x8x8xbf16>
      %178 = vector.shape_cast %177 : vector<1x1x8x8xbf16> to vector<8x8xbf16>
      %179 = vector.shape_cast %176 : vector<8x8xbf16> to vector<1x1x8x8xbf16>
      tpu.vector_store %arg6[%c0_155, %c1_156, %c0_157, %c0_158], %179 {strides = array<i32>} : memref<1x4x8x8xbf16, #tpu.memory_space<vmem>>, vector<1x1x8x8xbf16>,
    } else {
    }
    %c0_75 = arith.constant 0 : index
    %c0_76 = arith.constant 0 : index
    %c0_77 = arith.constant 0 : index
    %c2 = arith.constant 2 : index
    %c0_78 = arith.constant 0 : index
    %86 = vector.load %arg3[%c0_75, %c0_76, %c0_77, %c2, %c0_78] : memref<1x8x1x4x8xbf16, #tpu.memory_space<vmem>>, vector<1x8x1x1x8xbf16>
    %87 = vector.shape_cast %86 : vector<1x8x1x1x8xbf16> to vector<8x8xbf16>
    %c0_79 = arith.constant 0 : index
    %c0_80 = arith.constant 0 : index
    %c0_81 = arith.constant 0 : index
    %c2_82 = arith.constant 2 : index
    %c0_83 = arith.constant 0 : index
    %88 = vector.load %arg4[%c0_79, %c0_80, %c0_81, %c2_82, %c0_83] : memref<1x8x1x4x8xbf16, #tpu.memory_space<vmem>>, vector<1x8x1x1x8xbf16>
    %89 = vector.shape_cast %88 : vector<1x8x1x1x8xbf16> to vector<8x8xbf16>
    %c0_84 = arith.constant 0 : index
    %c0_85 = arith.constant 0 : index
    %c0_86 = arith.constant 0 : index
    %c2_87 = arith.constant 2 : index
    %c0_88 = arith.constant 0 : index
    %90 = vector.load %arg5[%c0_84, %c0_85, %c0_86, %c2_87, %c0_88] : memref<1x8x1x4x8xbf16, #tpu.memory_space<vmem>>, vector<1x8x1x1x8xbf16>
    %91 = vector.shape_cast %90 : vector<1x8x1x1x8xbf16> to vector<8x8xbf16>
    %cst_89 = arith.constant dense<0.000000e+00> : vector<8x8xf32>
    %92 = tpu.matmul %87, %89, %cst_89 {dimension_numbers = #tpu.dot_dimension_numbers<[1], [1], [0], [0], [0, 0, 1, 0], [], []>} : vector<8x8xbf16>, vector<8x8xbf16>, vector<8x8xf32> -> vector<8x8xf32>
    %c2_90 = arith.constant 2 : index
    %c0_91 = arith.constant 0 : index
    %c0_92 = arith.constant 0 : index
    %93 = vector.load %arg7[%c2_90, %c0_91, %c0_92] : memref<4x8x1xf32, #tpu.memory_space<vmem>>, vector<1x8x1xf32>
    %94 = vector.shape_cast %93 : vector<1x8x1xf32> to vector<8x1xf32>
    %cst_93 = arith.constant dense<0xFF800000> : vector<8xf32>
    %95 = vector.multi_reduction <maximumf>, %92, %cst_93 [1] : vector<8x8xf32> to vector<8xf32>
    %96 = vector.shape_cast %95 : vector<8xf32> to vector<8x1xf32>
    %97 = arith.maximumf %94, %96 : vector<8x1xf32>
    %98 = arith.subf %94, %97 : vector<8x1xf32>
    %99 = math.exp %98 : vector<8x1xf32>
    %100 = vector.broadcast %97 : vector<8x1xf32> to vector<8x8xf32>
    %101 = arith.subf %92, %100 : vector<8x8xf32>
    %102 = math.exp %101 : vector<8x8xf32>
    %c2_94 = arith.constant 2 : index
    %c0_95 = arith.constant 0 : index
    %c0_96 = arith.constant 0 : index
    %103 = vector.load %arg8[%c2_94, %c0_95, %c0_96] : memref<4x8x1xf32, #tpu.memory_space<vmem>>, vector<1x8x1xf32>
    %104 = vector.shape_cast %103 : vector<1x8x1xf32> to vector<8x1xf32>
    %105 = arith.mulf %99, %104 : vector<8x1xf32>
    %cst_97 = arith.constant dense<0.000000e+00> : vector<8xf32>
    %106 = vector.multi_reduction <add>, %102, %cst_97 [1] : vector<8x8xf32> to vector<8xf32>
    %107 = vector.shape_cast %106 : vector<8xf32> to vector<8x1xf32>
    %108 = arith.addf %105, %107 : vector<8x1xf32>
    %c2_98 = arith.constant 2 : index
    %c0_99 = arith.constant 0 : index
    %c0_100 = arith.constant 0 : index
    %109 = vector.load %arg8[%c2_98, %c0_99, %c0_100] : memref<4x8x1xf32, #tpu.memory_space<vmem>>, vector<1x8x1xf32>
    %110 = vector.shape_cast %109 : vector<1x8x1xf32> to vector<8x1xf32>
    %111 = vector.shape_cast %108 : vector<8x1xf32> to vector<1x8x1xf32>
    tpu.vector_store %arg8[%c2_98, %c0_99, %c0_100], %111 {strides = array<i32>} : memref<4x8x1xf32, #tpu.memory_space<vmem>>, vector<1x8x1xf32>,
    %c2_101 = arith.constant 2 : index
    %c0_102 = arith.constant 0 : index
    %c0_103 = arith.constant 0 : index
    %112 = vector.load %arg9[%c2_101, %c0_102, %c0_103] : memref<4x8x8xf32, #tpu.memory_space<vmem>>, vector<1x8x8xf32>
    %113 = vector.shape_cast %112 : vector<1x8x8xf32> to vector<8x8xf32>
    %114 = vector.broadcast %99 : vector<8x1xf32> to vector<8x8xf32>
    %115 = arith.mulf %114, %113 : vector<8x8xf32>
    %116 = arith.truncf %102 : vector<8x8xf32> to vector<8x8xbf16>
    %cst_104 = arith.constant dense<0.000000e+00> : vector<8x8xf32>
    %117 = tpu.matmul %116, %91, %cst_104 {dimension_numbers = #tpu.dot_dimension_numbers<[1], [0], [0], [1], [0, 0, 1, 1], [], []>} : vector<8x8xbf16>, vector<8x8xbf16>, vector<8x8xf32> -> vector<8x8xf32>
    %118 = arith.addf %115, %117 : vector<8x8xf32>
    %c2_105 = arith.constant 2 : index
    %c0_106 = arith.constant 0 : index
    %c0_107 = arith.constant 0 : index
    %119 = vector.load %arg9[%c2_105, %c0_106, %c0_107] : memref<4x8x8xf32, #tpu.memory_space<vmem>>, vector<1x8x8xf32>
    %120 = vector.shape_cast %119 : vector<1x8x8xf32> to vector<8x8xf32>
    %121 = vector.shape_cast %118 : vector<8x8xf32> to vector<1x8x8xf32>
    tpu.vector_store %arg9[%c2_105, %c0_106, %c0_107], %121 {strides = array<i32>} : memref<4x8x8xf32, #tpu.memory_space<vmem>>, vector<1x8x8xf32>,
    %c2_108 = arith.constant 2 : index
    %c0_109 = arith.constant 0 : index
    %c0_110 = arith.constant 0 : index
    %122 = vector.load %arg7[%c2_108, %c0_109, %c0_110] : memref<4x8x1xf32, #tpu.memory_space<vmem>>, vector<1x8x1xf32>
    %123 = vector.shape_cast %122 : vector<1x8x1xf32> to vector<8x1xf32>
    %124 = vector.shape_cast %97 : vector<8x1xf32> to vector<1x8x1xf32>
    tpu.vector_store %arg7[%c2_108, %c0_109, %c0_110], %124 {strides = array<i32>} : memref<4x8x1xf32, #tpu.memory_space<vmem>>, vector<1x8x1xf32>,
    %125 = arith.extui %0 : i1 to i32
    %c0_i32_111 = arith.constant 0 : i32
    %126 = arith.cmpi ne, %125, %c0_i32_111 : i32
    scf.if %126 {
      %c2_149 = arith.constant 2 : index
      %c0_150 = arith.constant 0 : index
      %c0_151 = arith.constant 0 : index
      %168 = vector.load %arg8[%c2_149, %c0_150, %c0_151] : memref<4x8x1xf32, #tpu.memory_space<vmem>>, vector<1x8x1xf32>
      %169 = vector.shape_cast %168 : vector<1x8x1xf32> to vector<8x1xf32>
      %170 = tpu.reciprocal %169 {approx = true} : vector<8x1xf32> -> vector<8x1xf32>
      %c2_152 = arith.constant 2 : index
      %c0_153 = arith.constant 0 : index
      %c0_154 = arith.constant 0 : index
      %171 = vector.load %arg9[%c2_152, %c0_153, %c0_154] : memref<4x8x8xf32, #tpu.memory_space<vmem>>, vector<1x8x8xf32>
      %172 = vector.shape_cast %171 : vector<1x8x8xf32> to vector<8x8xf32>
      %173 = vector.broadcast %170 : vector<8x1xf32> to vector<8x8xf32>
      %174 = arith.mulf %172, %173 : vector<8x8xf32>
      %175 = tpu.transpose %174, [1, 0] : vector<8x8xf32> -> vector<8x8xf32>
      %176 = arith.truncf %175 : vector<8x8xf32> to vector<8x8xbf16>
      %c0_155 = arith.constant 0 : index
      %c2_156 = arith.constant 2 : index
      %c0_157 = arith.constant 0 : index
      %c0_158 = arith.constant 0 : index
      %177 = vector.load %arg6[%c0_155, %c2_156, %c0_157, %c0_158] : memref<1x4x8x8xbf16, #tpu.memory_space<vmem>>, vector<1x1x8x8xbf16>
      %178 = vector.shape_cast %177 : vector<1x1x8x8xbf16> to vector<8x8xbf16>
      %179 = vector.shape_cast %176 : vector<8x8xbf16> to vector<1x1x8x8xbf16>
      tpu.vector_store %arg6[%c0_155, %c2_156, %c0_157, %c0_158], %179 {strides = array<i32>} : memref<1x4x8x8xbf16, #tpu.memory_space<vmem>>, vector<1x1x8x8xbf16>,
    } else {
    }
    %c0_112 = arith.constant 0 : index
    %c0_113 = arith.constant 0 : index
    %c0_114 = arith.constant 0 : index
    %c3 = arith.constant 3 : index
    %c0_115 = arith.constant 0 : index
    %127 = vector.load %arg3[%c0_112, %c0_113, %c0_114, %c3, %c0_115] : memref<1x8x1x4x8xbf16, #tpu.memory_space<vmem>>, vector<1x8x1x1x8xbf16>
    %128 = vector.shape_cast %127 : vector<1x8x1x1x8xbf16> to vector<8x8xbf16>
    %c0_116 = arith.constant 0 : index
    %c0_117 = arith.constant 0 : index
    %c0_118 = arith.constant 0 : index
    %c3_119 = arith.constant 3 : index
    %c0_120 = arith.constant 0 : index
    %129 = vector.load %arg4[%c0_116, %c0_117, %c0_118, %c3_119, %c0_120] : memref<1x8x1x4x8xbf16, #tpu.memory_space<vmem>>, vector<1x8x1x1x8xbf16>
    %130 = vector.shape_cast %129 : vector<1x8x1x1x8xbf16> to vector<8x8xbf16>
    %c0_121 = arith.constant 0 : index
    %c0_122 = arith.constant 0 : index
    %c0_123 = arith.constant 0 : index
    %c3_124 = arith.constant 3 : index
    %c0_125 = arith.constant 0 : index
    %131 = vector.load %arg5[%c0_121, %c0_122, %c0_123, %c3_124, %c0_125] : memref<1x8x1x4x8xbf16, #tpu.memory_space<vmem>>, vector<1x8x1x1x8xbf16>
    %132 = vector.shape_cast %131 : vector<1x8x1x1x8xbf16> to vector<8x8xbf16>
    %cst_126 = arith.constant dense<0.000000e+00> : vector<8x8xf32>
    %133 = tpu.matmul %128, %130, %cst_126 {dimension_numbers = #tpu.dot_dimension_numbers<[1], [1], [0], [0], [0, 0, 1, 0], [], []>} : vector<8x8xbf16>, vector<8x8xbf16>, vector<8x8xf32> -> vector<8x8xf32>
    %c3_127 = arith.constant 3 : index
    %c0_128 = arith.constant 0 : index
    %c0_129 = arith.constant 0 : index
    %134 = vector.load %arg7[%c3_127, %c0_128, %c0_129] : memref<4x8x1xf32, #tpu.memory_space<vmem>>, vector<1x8x1xf32>
    %135 = vector.shape_cast %134 : vector<1x8x1xf32> to vector<8x1xf32>
    %cst_130 = arith.constant dense<0xFF800000> : vector<8xf32>
    %136 = vector.multi_reduction <maximumf>, %133, %cst_130 [1] : vector<8x8xf32> to vector<8xf32>
    %137 = vector.shape_cast %136 : vector<8xf32> to vector<8x1xf32>
    %138 = arith.maximumf %135, %137 : vector<8x1xf32>
    %139 = arith.subf %135, %138 : vector<8x1xf32>
    %140 = math.exp %139 : vector<8x1xf32>
    %141 = vector.broadcast %138 : vector<8x1xf32> to vector<8x8xf32>
    %142 = arith.subf %133, %141 : vector<8x8xf32>
    %143 = math.exp %142 : vector<8x8xf32>
    %c3_131 = arith.constant 3 : index
    %c0_132 = arith.constant 0 : index
    %c0_133 = arith.constant 0 : index
    %144 = vector.load %arg8[%c3_131, %c0_132, %c0_133] : memref<4x8x1xf32, #tpu.memory_space<vmem>>, vector<1x8x1xf32>
    %145 = vector.shape_cast %144 : vector<1x8x1xf32> to vector<8x1xf32>
    %146 = arith.mulf %140, %145 : vector<8x1xf32>
    %cst_134 = arith.constant dense<0.000000e+00> : vector<8xf32>
    %147 = vector.multi_reduction <add>, %143, %cst_134 [1] : vector<8x8xf32> to vector<8xf32>
    %148 = vector.shape_cast %147 : vector<8xf32> to vector<8x1xf32>
    %149 = arith.addf %146, %148 : vector<8x1xf32>
    %c3_135 = arith.constant 3 : index
    %c0_136 = arith.constant 0 : index
    %c0_137 = arith.constant 0 : index
    %150 = vector.load %arg8[%c3_135, %c0_136, %c0_137] : memref<4x8x1xf32, #tpu.memory_space<vmem>>, vector<1x8x1xf32>
    %151 = vector.shape_cast %150 : vector<1x8x1xf32> to vector<8x1xf32>
    %152 = vector.shape_cast %149 : vector<8x1xf32> to vector<1x8x1xf32>
    tpu.vector_store %arg8[%c3_135, %c0_136, %c0_137], %152 {strides = array<i32>} : memref<4x8x1xf32, #tpu.memory_space<vmem>>, vector<1x8x1xf32>,
    %c3_138 = arith.constant 3 : index
    %c0_139 = arith.constant 0 : index
    %c0_140 = arith.constant 0 : index
    %153 = vector.load %arg9[%c3_138, %c0_139, %c0_140] : memref<4x8x8xf32, #tpu.memory_space<vmem>>, vector<1x8x8xf32>
    %154 = vector.shape_cast %153 : vector<1x8x8xf32> to vector<8x8xf32>
    %155 = vector.broadcast %140 : vector<8x1xf32> to vector<8x8xf32>
    %156 = arith.mulf %155, %154 : vector<8x8xf32>
    %157 = arith.truncf %143 : vector<8x8xf32> to vector<8x8xbf16>
    %cst_141 = arith.constant dense<0.000000e+00> : vector<8x8xf32>
    %158 = tpu.matmul %157, %132, %cst_141 {dimension_numbers = #tpu.dot_dimension_numbers<[1], [0], [0], [1], [0, 0, 1, 1], [], []>} : vector<8x8xbf16>, vector<8x8xbf16>, vector<8x8xf32> -> vector<8x8xf32>
    %159 = arith.addf %156, %158 : vector<8x8xf32>
    %c3_142 = arith.constant 3 : index
    %c0_143 = arith.constant 0 : index
    %c0_144 = arith.constant 0 : index
    %160 = vector.load %arg9[%c3_142, %c0_143, %c0_144] : memref<4x8x8xf32, #tpu.memory_space<vmem>>, vector<1x8x8xf32>
    %161 = vector.shape_cast %160 : vector<1x8x8xf32> to vector<8x8xf32>
    %162 = vector.shape_cast %159 : vector<8x8xf32> to vector<1x8x8xf32>
    tpu.vector_store %arg9[%c3_142, %c0_143, %c0_144], %162 {strides = array<i32>} : memref<4x8x8xf32, #tpu.memory_space<vmem>>, vector<1x8x8xf32>,
    %c3_145 = arith.constant 3 : index
    %c0_146 = arith.constant 0 : index
    %c0_147 = arith.constant 0 : index
    %163 = vector.load %arg7[%c3_145, %c0_146, %c0_147] : memref<4x8x1xf32, #tpu.memory_space<vmem>>, vector<1x8x1xf32>
    %164 = vector.shape_cast %163 : vector<1x8x1xf32> to vector<8x1xf32>
    %165 = vector.shape_cast %138 : vector<8x1xf32> to vector<1x8x1xf32>
    tpu.vector_store %arg7[%c3_145, %c0_146, %c0_147], %165 {strides = array<i32>} : memref<4x8x1xf32, #tpu.memory_space<vmem>>, vector<1x8x1xf32>,
    %166 = arith.extui %0 : i1 to i32
    %c0_i32_148 = arith.constant 0 : i32
    %167 = arith.cmpi ne, %166, %c0_i32_148 : i32
    scf.if %167 {
      %c3_149 = arith.constant 3 : index
      %c0_150 = arith.constant 0 : index
      %c0_151 = arith.constant 0 : index
      %168 = vector.load %arg8[%c3_149, %c0_150, %c0_151] : memref<4x8x1xf32, #tpu.memory_space<vmem>>, vector<1x8x1xf32>
      %169 = vector.shape_cast %168 : vector<1x8x1xf32> to vector<8x1xf32>
      %170 = tpu.reciprocal %169 {approx = true} : vector<8x1xf32> -> vector<8x1xf32>
      %c3_152 = arith.constant 3 : index
      %c0_153 = arith.constant 0 : index
      %c0_154 = arith.constant 0 : index
      %171 = vector.load %arg9[%c3_152, %c0_153, %c0_154] : memref<4x8x8xf32, #tpu.memory_space<vmem>>, vector<1x8x8xf32>
      %172 = vector.shape_cast %171 : vector<1x8x8xf32> to vector<8x8xf32>
      %173 = vector.broadcast %170 : vector<8x1xf32> to vector<8x8xf32>
      %174 = arith.mulf %172, %173 : vector<8x8xf32>
      %175 = tpu.transpose %174, [1, 0] : vector<8x8xf32> -> vector<8x8xf32>
      %176 = arith.truncf %175 : vector<8x8xf32> to vector<8x8xbf16>
      %c0_155 = arith.constant 0 : index
      %c3_156 = arith.constant 3 : index
      %c0_157 = arith.constant 0 : index
      %c0_158 = arith.constant 0 : index
      %177 = vector.load %arg6[%c0_155, %c3_156, %c0_157, %c0_158] : memref<1x4x8x8xbf16, #tpu.memory_space<vmem>>, vector<1x1x8x8xbf16>
      %178 = vector.shape_cast %177 : vector<1x1x8x8xbf16> to vector<8x8xbf16>
      %179 = vector.shape_cast %176 : vector<8x8xbf16> to vector<1x1x8x8xbf16>
      tpu.vector_store %arg6[%c0_155, %c3_156, %c0_157, %c0_158], %179 {strides = array<i32>} : memref<1x4x8x8xbf16, #tpu.memory_space<vmem>>, vector<1x1x8x8xbf16>,
    } else {
    }
    return
  }
  func.func @transform_0(%arg0: i32, %arg1: i32, %arg2: i32) -> (i32, i32, i32, i32, i32) {
    %c0_i32 = arith.constant 0 : i32
    %c0_i32_0 = arith.constant 0 : i32
    %c0_i32_1 = arith.constant 0 : i32
    %c0_i32_2 = arith.constant 0 : i32
    return %arg0, %arg1, %c0_i32, %c0_i32_0, %c0_i32_1 : i32, i32, i32, i32, i32
  }
  func.func @transform_1(%arg0: i32, %arg1: i32, %arg2: i32) -> (i32, i32, i32, i32, i32) {
    %c1_i32 = arith.constant 1 : i32
    %c0_i32 = arith.constant 0 : i32
    %c0_i32_0 = arith.constant 0 : i32
    %c0_i32_1 = arith.constant 0 : i32
    return %arg0, %arg2, %c1_i32, %c0_i32, %c0_i32_0 : i32, i32, i32, i32, i32
  }
  func.func @transform_2(%arg0: i32, %arg1: i32, %arg2: i32) -> (i32, i32, i32, i32, i32) {
    %c2_i32 = arith.constant 2 : i32
    %c0_i32 = arith.constant 0 : i32
    %c0_i32_0 = arith.constant 0 : i32
    %c0_i32_1 = arith.constant 0 : i32
    return %arg0, %arg2, %c2_i32, %c0_i32, %c0_i32_0 : i32, i32, i32, i32, i32
  }
  func.func @transform_3(%arg0: i32, %arg1: i32, %arg2: i32) -> (i32, i32, i32, i32) {
    %c0_i32 = arith.constant 0 : i32
    %c0_i32_0 = arith.constant 0 : i32
    %c0_i32_1 = arith.constant 0 : i32
    return %arg0, %c0_i32, %c0_i32_0, %arg1 : i32, i32, i32, i32
  }
}

module attributes {stable_mosaic.version = 11 : i64} {
  func.func @_linear_kernel(%arg0: i32, %arg1: i32, %arg2: i32, %arg3: memref<16x32xbf16, #tpu.memory_space<vmem>>, %arg4: memref<32x32xbf16, #tpu.memory_space<vmem>>, %arg5: memref<1x32xf32, #tpu.memory_space<vmem>>, %arg6: memref<16x32xf32, #tpu.memory_space<vmem>>, %arg7: memref<16x32xf32, #tpu.memory_space<vmem>>) attributes {dimension_semantics = [#tpu.dimension_semantics<parallel>, #tpu.dimension_semantics<parallel>, #tpu.dimension_semantics<arbitrary>], iteration_bounds = array<i64: 1, 1, 1>, scalar_prefetch = 0 : i64, scratch_operands = 1 : i64, tpu.core_type = #tpu.core_type<tc>, window_params = [{transform_indices = @transform_0, window_bounds = array<i64: 16, 32>}, {transform_indices = @transform_1, window_bounds = array<i64: 32, 32>}, {transform_indices = @transform_2, window_bounds = array<i64: 1, 32>}, {transform_indices = @transform_3, window_bounds = array<i64: 16, 32>}]} {
    %c0_i32 = arith.constant 0 : i32
    %0 = arith.cmpi eq, %arg2, %c0_i32 : i32
    %1 = arith.extui %0 : i1 to i32
    %c0_i32_0 = arith.constant 0 : i32
    %2 = arith.cmpi ne, %1, %c0_i32_0 : i32
    scf.if %2 {
      %cst_10 = arith.constant 0.000000e+00 : f32
      %12 = vector.broadcast %cst_10 : f32 to vector<16x32xf32>
      %c0_11 = arith.constant 0 : index
      %c0_12 = arith.constant 0 : index
      %13 = vector.load %arg7[%c0_11, %c0_12] : memref<16x32xf32, #tpu.memory_space<vmem>>, vector<16x32xf32>
      tpu.vector_store %arg7[%c0_11, %c0_12], %12 {strides = array<i32>} : memref<16x32xf32, #tpu.memory_space<vmem>>, vector<16x32xf32>,
    } else {
    }
    %c0 = arith.constant 0 : index
    %c0_1 = arith.constant 0 : index
    %3 = vector.load %arg7[%c0, %c0_1] : memref<16x32xf32, #tpu.memory_space<vmem>>, vector<16x32xf32>
    %c0_2 = arith.constant 0 : index
    %c0_3 = arith.constant 0 : index
    %4 = vector.load %arg3[%c0_2, %c0_3] : memref<16x32xbf16, #tpu.memory_space<vmem>>, vector<16x32xbf16>
    %c0_4 = arith.constant 0 : index
    %c0_5 = arith.constant 0 : index
    %5 = vector.load %arg4[%c0_4, %c0_5] : memref<32x32xbf16, #tpu.memory_space<vmem>>, vector<32x32xbf16>
    %cst = arith.constant dense<0.000000e+00> : vector<16x32xf32>
    %6 = tpu.matmul %4, %5, %cst {dimension_numbers = #tpu.dot_dimension_numbers<[1], [0], [0], [1], [0, 0, 1, 1], [], []>} : vector<16x32xbf16>, vector<32x32xbf16>, vector<16x32xf32> -> vector<16x32xf32>
    %7 = arith.addf %3, %6 : vector<16x32xf32>
    %c0_6 = arith.constant 0 : index
    %c0_7 = arith.constant 0 : index
    %8 = vector.load %arg7[%c0_6, %c0_7] : memref<16x32xf32, #tpu.memory_space<vmem>>, vector<16x32xf32>
    tpu.vector_store %arg7[%c0_6, %c0_7], %7 {strides = array<i32>} : memref<16x32xf32, #tpu.memory_space<vmem>>, vector<16x32xf32>,
    %c0_i32_8 = arith.constant 0 : i32
    %9 = arith.cmpi eq, %arg2, %c0_i32_8 : i32
    %10 = arith.extui %9 : i1 to i32
    %c0_i32_9 = arith.constant 0 : i32
    %11 = arith.cmpi ne, %10, %c0_i32_9 : i32
    scf.if %11 {
      %c0_10 = arith.constant 0 : index
      %c0_11 = arith.constant 0 : index
      %12 = vector.load %arg7[%c0_10, %c0_11] : memref<16x32xf32, #tpu.memory_space<vmem>>, vector<16x32xf32>
      %c0_12 = arith.constant 0 : index
      %c0_13 = arith.constant 0 : index
      %13 = vector.load %arg5[%c0_12, %c0_13] : memref<1x32xf32, #tpu.memory_space<vmem>>, vector<1x32xf32>
      %14 = vector.broadcast %13 : vector<1x32xf32> to vector<16x32xf32>
      %15 = arith.addf %12, %14 : vector<16x32xf32>
      %c0_14 = arith.constant 0 : index
      %c0_15 = arith.constant 0 : index
      %16 = vector.load %arg6[%c0_14, %c0_15] : memref<16x32xf32, #tpu.memory_space<vmem>>, vector<16x32xf32>
      tpu.vector_store %arg6[%c0_14, %c0_15], %15 {strides = array<i32>} : memref<16x32xf32, #tpu.memory_space<vmem>>, vector<16x32xf32>,
    } else {
    }
    return
  }
  func.func @transform_0(%arg0: i32, %arg1: i32, %arg2: i32) -> (i32, i32) {
    %c0_i32 = arith.constant 0 : i32
    return %arg0, %arg2 : i32, i32
  }
  func.func @transform_1(%arg0: i32, %arg1: i32, %arg2: i32) -> (i32, i32) {
    %c0_i32 = arith.constant 0 : i32
    return %arg2, %arg1 : i32, i32
  }
  func.func @transform_2(%arg0: i32, %arg1: i32, %arg2: i32) -> (i32, i32) {
    %c0_i32 = arith.constant 0 : i32
    %c0_i32_0 = arith.constant 0 : i32
    return %c0_i32, %arg1 : i32, i32
  }
  func.func @transform_3(%arg0: i32, %arg1: i32, %arg2: i32) -> (i32, i32) {
    %c0_i32 = arith.constant 0 : i32
    return %arg0, %arg1 : i32, i32
  }
}

</mosaic_0001>

<bundles_post_ra>
// kernel: multi_head_attention.3
= control target key start
LH: loop header
LB: loop body
LE: loop exit
PB: predicated region body
PF: predicated region fallthrough
CT: control target
= control target key end

     0   :  { %vm19_vm0 = vcmask 785408   ;;  %v108_v1 = vmov 0.0   ;;  %vm47_vm1 = vcmask 261120   ;;  %vm83_vm2 = vcmask 781312   ;;  %s151_s1 = inlined_call_operand.vmem [shape: bf16[32,96], index: 1, kind: input, shape index: {}]   ;;  %s152_s2 = inlined_call_operand.vmem [shape: f32[1,96], index: 2, kind: input, shape index: {}]   ;;  %s153_s0 = inlined_call_operand.vmem [shape: bf16[16,32], index: 0, kind: input, shape index: {}]   ;;  %s154_s3 = inlined_call_operand.vmem [shape: bf16[16,96], index: 3, kind: output, shape index: {}]  }
   0x1   :  { %v105_v0 = vld [vmem:[%s151_s1 + $0x8] sm:$0xff]  ;;  %20 = vst.msk [vmem:[#allocation2] sm:$0xff] %vm19_vm0, %v108_v1  ;;  %v104_v2 = vld [vmem:[%s151_s1] sm:$0xff] }
   0x2   :  { %21 = vst.msk [vmem:[#allocation2 + $0x8] sm:$0xff] %vm19_vm0, %v108_v1  ;;  %57 = vmatpush.bf16.msra.mxu0 %v105_v0  ;;  %v103_v3 = vld [vmem:[%s153_s0] sm:$0xff] }
   0x3   :  { %v107_v8 = vld [vmem:[%s152_s2] ss:$0 sm:$0xff] }
   0x6   :  { %58 = vmatpush.bf16.msra.mxu0 %v104_v2 }
   0x8   :  { %v22_v4 = vld [vmem:[#allocation2] sm:$0xff] }
   0x9   :  { %102 = vmatmul.msk.bf16.vlgmr.msra.gmra.mxu0 %vm47_vm1, %v103_v3  ;;  %v23_v7 = vld [vmem:[#allocation2 + $0x8] sm:$0xff] }
  0x86   :  { %v60_v5 = vpop.f32.mrf.mxu0 }
  0x87   :  { %v65_v6 = vadd.f32 %v60_v5, %v22_v4 }
  0x89   :  { %68 = vst.msk [vmem:[#allocation2] sm:$0xff] %vm19_vm0, %v65_v6 }
  0x8e   :  { %v62_v9 = vpop.f32.mrf.mxu0 }
  0x8f   :  { %v66_v10 = vadd.f32 %v62_v9, %v23_v7 }
  0x90   :  { %v73_v11 = vld [vmem:[#allocation2] sm:$0xff] }
  0x91   :  { %v79_v12 = vadd.f32 %v107_v8, %v73_v11  ;;  %69 = vst.msk [vmem:[#allocation2 + $0x8] sm:$0xff] %vm19_vm0, %v66_v10 }
  0x93   :  { %v81_v13 = vpack.c.bf16 %v79_v12, %v79_v12 }
  0x95   :  { %84 = vst.msk [vmem:[%s154_s3] sm:$0xf] %vm83_vm2, %v81_v13 }
  0x98   :  { %v74_v14 = vld [vmem:[#allocation2 + $0x8] sm:$0xff] }
  0x99   :  { %v80_v15 = vadd.f32 %v107_v8, %v74_v14 }
  0x9b   :  { %v82_v16 = vpack.c.bf16 %v80_v15, %v80_v15 }
  0x9d   :  { %85 = vst.msk [vmem:[%s154_s3 + $0x4] sm:$0xf] %vm83_vm2, %v82_v16 }

// kernel: multi_head_attention.5
= control target key start
LH: loop header
LB: loop body
LE: loop exit
PB: predicated region body
PF: predicated region fallthrough
CT: control target
= control target key end

     0   :  { %vm20_vm0 = vcmask 261120   ;;  %v148_v1 = vmov 0.0   ;;  %s194_s0 = inlined_call_operand.vmem [shape: bf16[16,32], index: 0, kind: input, shape index: {}]   ;;  %s195_s1 = inlined_call_operand.vmem [shape: bf16[32,32], index: 1, kind: input, shape index: {}]   ;;  %s196_s2 = inlined_call_operand.vmem [shape: f32[1,32], index: 2, kind: input, shape index: {}]   ;;  %s197_s3 = inlined_call_operand.hbm [shape: f32[16,32], index: 3, kind: output, shape index: {}]  }
   0x1   :  { %v116_v0 = vld [vmem:[%s195_s1 + $0x8] sm:$0xff]  ;;  %21 = vst.msk [vmem:[#allocation2] sm:$0xff] %vm20_vm0, %v148_v1 }
   0x2   :  { %8 = vsyncpa [#allocation4], 0  ;;  %58 = vmatpush.bf16.msra.mxu0 %v116_v0  ;;  %v115_v2 = vld [vmem:[%s195_s1] sm:$0xff]  ;;  %22 = vst.msk [vmem:[#allocation2 + $0x8] sm:$0xff] %vm20_vm0, %v148_v1  ;;  %s89_s22 = sshll.u32 %s197_s3, 4  ;;  %s151_s23 = smov 8   ;;  %s90_s22 = int_to_ptr.hbm [resolvable:$true] %s89_s22 }
   0x3   :  { %v114_v3 = vld [vmem:[%s194_s0] sm:$0xff]  ;;  %s149_s0 = smov [#allocation3]  }
   0x4   :  { %v121_v8 = vld [vmem:[%s196_s2] ss:$0 sm:$0xff]  ;;  %s87_s1 = sshll.u32 %s149_s0, 4  ;;  %s150_s2 = smov 128   ;;  %s88_s1 = int_to_ptr.vmem [resolvable:$true] %s87_s1 }
   0x6   :  { %59 = vmatpush.bf16.msra.mxu0 %v115_v2 }
   0x8   :  { %v23_v4 = vld [vmem:[#allocation2] sm:$0xff] }
   0x9   :  { %113 = vmatmul.msk.bf16.vlgmr.msra.gmra.mxu0 %vm20_vm0, %v114_v3  ;;  %v24_v7 = vld [vmem:[#allocation2 + $0x8] sm:$0xff] }
  0x86   :  { %v61_v5 = vpop.f32.mrf.mxu0 }
  0x87   :  { %v66_v6 = vadd.f32 %v61_v5, %v23_v4 }
  0x89   :  { %68 = vst.msk [vmem:[#allocation2] sm:$0xff] %vm20_vm0, %v66_v6 }
  0x8e   :  { %v63_v9 = vpop.f32.mrf.mxu0 }
  0x8f   :  { %v67_v10 = vadd.f32 %v63_v9, %v24_v7 }
  0x90   :  { %v73_v11 = vld [vmem:[#allocation2] sm:$0xff] }
  0x91   :  { %69 = vst.msk [vmem:[#allocation2 + $0x8] sm:$0xff] %vm20_vm0, %v67_v10  ;;  %v79_v12 = vadd.f32 %v121_v8, %v73_v11 }
  0x93   :  { %81 = vst.msk [vmem:[#allocation3] sm:$0xff] %vm20_vm0, %v79_v12 }
  0x98   :  { %v74_v13 = vld [vmem:[#allocation2 + $0x8] sm:$0xff] }
  0x99   :  { %v80_v14 = vadd.f32 %v121_v8, %v74_v13 }
  0x9b   :  { %82 = vst.msk [vmem:[#allocation3 + $0x8] sm:$0xff] %vm20_vm0, %v80_v14 }
  0x9c   :  { %95 = dma.vmem_to_hbm [thread:$0]  %s88_s1, 256, %s90_s22, [#allocation4], %s150_s2, %s150_s2, %s151_s23  }
  0x9d   :  { %146 = dma.done.wait [#allocation4], 256  }
  0x9e   :  { %147 = vsyncadd [#allocation4], 4294967040 }
  0x9f   :  { %100 = vsyncpa [#allocation4], 1 }

// kernel: multi_head_attention.4
= control target key start
LH: loop header
LB: loop body
LE: loop exit
PB: predicated region body
PF: predicated region fallthrough
CT: control target
= control target key end

     0   :  { %s2072_s12 = smov 0   ;;  %s2074_s13 = smov 0   ;;  %s2619_s0 = inlined_call_operand.vmem [shape: bf16[2,8,3,4,8], index: 0, kind: input, shape index: {}, may-alias: {0,1,2}]   ;;  %s2620_s1 = inlined_call_operand.vmem [shape: bf16[2,8,3,4,8], index: 1, kind: input, shape index: {}, may-alias: {0,1,2}]   ;;  %s2621_s2 = inlined_call_operand.vmem [shape: bf16[2,8,3,4,8], index: 2, kind: input, shape index: {}, may-alias: {0,1,2}]   ;;  %s2622_s3 = inlined_call_operand.vmem [shape: bf16[2,4,8,8], index: 3, kind: output, shape index: {}]  }
   0x1   :  { %s2076_s14 = smov 0   ;;  %s2078_s15 = smov 0  }
   0x2   :  { %s2080_s16 = smov 0  }
   0x3 LB: > { %s32_s17 = sadd.s32 1, %s2043_s15  ;;  %p48_p1 = scmp.ne.s32.totalorder %s2035_s13, %s2031_s12  ;;  %s2047_s16 = sphi %s2080_s16, %s13_s16   ;;  %s2043_s15 = sphi %s2078_s15, %s2643_s15   ;;  %s2039_s14 = sphi %s2076_s14, %s2642_s14   ;;  %s2035_s13 = sphi %s2074_s13, %s2641_s13   ;;  %s2031_s12 = sphi %s2072_s12, %s2640_s12  }
   0x4   : > { %p34_p0 = scmp.ge.s32.totalorder %s32_s17, 2  ;;  %p49_p2 = scmp.eq.s32.totalorder %s2047_s16, 0 }
   0x5   : > { %s41_s20 = sadd.s32 1, %s2035_s13  ;;  %p1895_p5 = scmp.ge.s32.totalorder %s2047_s16, 2 }
   0x6   : > { %s2645_s17 = smov (%p34_p0, %s32_s17), 0  ;;  %p2103_p3 = por %p49_p2, %p48_p1 }
   0x7   : > { %s36_s19 = ssub.s32 %s2043_s15, %s2645_s17  ;;  %158 = sbr.rel (%p1895_p5) target bundleno = 51 (0x33), region = 16 }
   0x8   : > { %p39_p4 = scmp.eq.s32.totalorder %s36_s19, 0 }
   0xa   : > { %s2111_s21 = scalar_select %p39_p4, %s2035_s13, %s41_s20  }
   0xc   : > { %161 = sbr.rel (!%p2103_p3) target bundleno = 25 (0x19), region = 20  ;;  %s163_s22 = sand.u32 (%p2103_p3), 1, %s2035_s13  }
   0xd   : > { %s1938_s23 = smul.u32 (%p2103_p3), 48, %s2043_s15  ;;  %s1896_s24 = sshll.u32 (%p2103_p3), %s163_s22, 4 }
   0xe   : > { %s165_s28 = scalar_lea.vmem (%p2103_p3), [#allocation5], %s1896_s24 }
   0xf   : > { %s171_s27 = scalar_lea.vmem (%p2103_p3), %s2619_s0, %s1938_s23 }
  0x10   : > { %v188_v0 = vld [vmem:[%s171_s27] sm:$0x3] (%p2103_p3)  ;;  %v190_v1 = vld [vmem:[%s171_s27 + $0x6] sm:$0x3] (%p2103_p3)  ;;  %v192_v2 = vld [vmem:[%s171_s27 + $0xc] sm:$0x3] (%p2103_p3) }
  0x11   : > { %189 = vst [vmem:[%s165_s28] sm:$0x3] %v188_v0  ;;  %v194_v3 = vld [vmem:[%s171_s27 + $0x12] sm:$0x3]  ;;  %v196_v4 = vld [vmem:[%s171_s27 + $0x18] sm:$0x3] }
  0x12   : > { %191 = vst [vmem:[%s165_s28 + $0x2] sm:$0x3] %v190_v1  ;;  %v198_v5 = vld [vmem:[%s171_s27 + $0x1e] sm:$0x3]  ;;  %v200_v6 = vld [vmem:[%s171_s27 + $0x24] sm:$0x3] }
  0x13   : > { %193 = vst [vmem:[%s165_s28 + $0x4] sm:$0x3] %v192_v2  ;;  %v202_v7 = vld [vmem:[%s171_s27 + $0x2a] sm:$0x3] }
  0x14   : > { %195 = vst [vmem:[%s165_s28 + $0x6] sm:$0x3] %v194_v3 }
  0x15   : > { %197 = vst [vmem:[%s165_s28 + $0x8] sm:$0x3] %v196_v4 }
  0x16   : > { %199 = vst [vmem:[%s165_s28 + $0xa] sm:$0x3] %v198_v5 }
  0x17   : > { %201 = vst [vmem:[%s165_s28 + $0xc] sm:$0x3] %v200_v6 }
  0x18   : > { %203 = vst [vmem:[%s165_s28 + $0xe] sm:$0x3] %v202_v7 }
  0x19 PF: > { %243 = sbr.rel (!%p2103_p3) target bundleno = 38 (0x26), region = 61  ;;  %s245_s29 = sand.u32 (%p2103_p3), 1, %s2035_s13  }
  0x1a   : > { %s1899_s30 = smul.u32 (%p2103_p3), 48, %s2043_s15  ;;  %s1898_s4 = sshll.u32 (%p2103_p3), %s245_s29, 4 }
  0x1b   : > { %s247_s8 = scalar_lea.vmem (%p2103_p3), [#allocation6], %s1898_s4 }
  0x1c   : > { %s1799_s7 = scalar_lea.vmem (%p2103_p3), %s2620_s1, %s1899_s30 }
  0x1d   : > { %v1900_v8 = vld [vmem:[%s1799_s7 + $0x2] sm:$0x3] (%p2103_p3)  ;;  %v1901_v9 = vld [vmem:[%s1799_s7 + $0x8] sm:$0x3] (%p2103_p3)  ;;  %v1902_v10 = vld [vmem:[%s1799_s7 + $0xe] sm:$0x3] (%p2103_p3) }
  0x1e   : > { %272 = vst [vmem:[%s247_s8] sm:$0x3] %v1900_v8  ;;  %v1903_v11 = vld [vmem:[%s1799_s7 + $0x14] sm:$0x3]  ;;  %v1904_v12 = vld [vmem:[%s1799_s7 + $0x1a] sm:$0x3] }
  0x1f   : > { %274 = vst [vmem:[%s247_s8 + $0x2] sm:$0x3] %v1901_v9  ;;  %v1905_v13 = vld [vmem:[%s1799_s7 + $0x20] sm:$0x3]  ;;  %v1906_v14 = vld [vmem:[%s1799_s7 + $0x26] sm:$0x3] }
  0x20   : > { %276 = vst [vmem:[%s247_s8 + $0x4] sm:$0x3] %v1902_v10  ;;  %v1907_v15 = vld [vmem:[%s1799_s7 + $0x2c] sm:$0x3] }
  0x21   : > { %278 = vst [vmem:[%s247_s8 + $0x6] sm:$0x3] %v1903_v11 }
  0x22   : > { %280 = vst [vmem:[%s247_s8 + $0x8] sm:$0x3] %v1904_v12 }
  0x23   : > { %282 = vst [vmem:[%s247_s8 + $0xa] sm:$0x3] %v1905_v13 }
  0x24   : > { %284 = vst [vmem:[%s247_s8 + $0xc] sm:$0x3] %v1906_v14 }
  0x25   : > { %286 = vst [vmem:[%s247_s8 + $0xe] sm:$0x3] %v1907_v15 }
  0x26 PF: > { %326 = sbr.rel (!%p2103_p3) target bundleno = 51 (0x33), region = 102  ;;  %s328_s9 = sand.u32 (%p2103_p3), 1, %s2035_s13  }
  0x27   : > { %s1909_s10 = smul.u32 (%p2103_p3), 48, %s2043_s15  ;;  %s1908_s11 = sshll.u32 (%p2103_p3), %s328_s9, 4 }
  0x28   : > { %s330_s23 = scalar_lea.vmem (%p2103_p3), [#allocation7], %s1908_s11 }
  0x29   : > { %s1807_s22 = scalar_lea.vmem (%p2103_p3), %s2621_s2, %s1909_s10 }
  0x2a   : > { %v1910_v16 = vld [vmem:[%s1807_s22 + $0x4] sm:$0x3] (%p2103_p3)  ;;  %v1911_v17 = vld [vmem:[%s1807_s22 + $0xa] sm:$0x3] (%p2103_p3)  ;;  %v1912_v18 = vld [vmem:[%s1807_s22 + $0x10] sm:$0x3] (%p2103_p3) }
  0x2b   : > { %355 = vst [vmem:[%s330_s23] sm:$0x3] %v1910_v16  ;;  %v1913_v19 = vld [vmem:[%s1807_s22 + $0x16] sm:$0x3]  ;;  %v1914_v20 = vld [vmem:[%s1807_s22 + $0x1c] sm:$0x3] }
  0x2c   : > { %357 = vst [vmem:[%s330_s23 + $0x2] sm:$0x3] %v1911_v17  ;;  %v1915_v21 = vld [vmem:[%s1807_s22 + $0x22] sm:$0x3]  ;;  %v1916_v22 = vld [vmem:[%s1807_s22 + $0x28] sm:$0x3] }
  0x2d   : > { %359 = vst [vmem:[%s330_s23 + $0x4] sm:$0x3] %v1912_v18  ;;  %v1917_v23 = vld [vmem:[%s1807_s22 + $0x2e] sm:$0x3] }
  0x2e   : > { %361 = vst [vmem:[%s330_s23 + $0x6] sm:$0x3] %v1913_v19 }
  0x2f   : > { %363 = vst [vmem:[%s330_s23 + $0x8] sm:$0x3] %v1914_v20 }
  0x30   : > { %365 = vst [vmem:[%s330_s23 + $0xa] sm:$0x3] %v1915_v21 }
  0x31   : > { %367 = vst [vmem:[%s330_s23 + $0xc] sm:$0x3] %v1916_v22 }
  0x32   : > { %369 = vst [vmem:[%s330_s23 + $0xe] sm:$0x3] %v1917_v23 }
  0x33 PF: > { %p1918_p6 = scmp.ge.s32.totalorder %s2047_s16, 1  ;;  %p408_p7 = scmp.lt.s32.totalorder %s2047_s16, 3 }
  0x35   : > { %p409_p8 = pnand %p1918_p6, %p408_p7 }
  0x37   : > { %412 = sbr.rel (%p409_p8) target bundleno = 1538 (0x602), region = 143 }
  0x3c   : > { %s415_s18 = sand.u32 1, %s2031_s12   ;;  %vm559_vm0 = vcmask 1041409   ;;  %vm562_vm1 = vcmask 1042434   ;;  %vm565_vm2 = vcmask 1043459   ;;  %vm568_vm3 = vcmask 1044484   ;;  %p466_p9 = scmp.lt.s32.totalorder %s2039_s14, 1 }
  0x3d   : > { %s2138_s24 = sshll.u32 %s415_s18, 4  ;;  %vm571_vm4 = vcmask 1045509   ;;  %vm574_vm5 = vcmask 1046534   ;;  %vm577_vm6 = vcmask 1047559   ;;  %vm488_vm7 = vcmask 64512  }
  0x3e   : > { %s2141_s25 = scalar_lea.vmem [#allocation5], %s2138_s24  ;;  %s2154_s12 = scalar_lea.vmem [#allocation6], %s2138_s24  ;;  %vm479_vm8 = vcmask 7168   ;;  %vm747_vm9 = vcmask 1043456   ;;  %vm812_vm10 = vcmask 60416  }
  0x3f   : > { %v493_v24 = vld [vmem:[%s2141_s25] sm:$0x1]  ;;  %v494_v25 = vld [vmem:[%s2141_s25 + $0x2] sm:$0x1]  ;;  %v495_v26 = vld [vmem:[%s2141_s25 + $0x4] sm:$0x1] }
  0x40   : > { %518 = vst [vmem:[#allocation1] ss:$4 sm:$0xff] %v493_v24  ;;  %v496_v27 = vld [vmem:[%s2141_s25 + $0x6] sm:$0x1]  ;;  %v497_v30 = vld [vmem:[%s2141_s25 + $0x8] sm:$0x1] }
  0x41   : > { %523 = vst [vmem:[#allocation1 + $0x20] ss:$4 sm:$0xff] %v494_v25  ;;  %v498_v31 = vld [vmem:[%s2141_s25 + $0xa] sm:$0x1]  ;;  %v499_v34 = vld [vmem:[%s2141_s25 + $0xc] sm:$0x1] }
  0x42   : > { %v500_v35 = vld [vmem:[%s2141_s25 + $0xe] sm:$0x1]  ;;  %v501_v38 = vld [vmem:[%s2154_s12] sm:$0x1]  ;;  %v502_v39 = vld [vmem:[%s2154_s12 + $0x2] sm:$0x1] }
  0x43   : > { %v503_v42 = vld [vmem:[%s2154_s12 + $0x4] sm:$0x1]  ;;  %v504_v43 = vld [vmem:[%s2154_s12 + $0x6] sm:$0x1]  ;;  %v505_v46 = vld [vmem:[%s2154_s12 + $0x8] sm:$0x1] }
  0x44   : > { %v506_v48 = vld [vmem:[%s2154_s12 + $0xa] sm:$0x1]  ;;  %v507_v60 = vld [vmem:[%s2154_s12 + $0xc] sm:$0x1]  ;;  %v508_v63 = vld [vmem:[%s2154_s12 + $0xe] sm:$0x1] }
  0x45   : > { %s2175_s26 = scalar_lea.vmem [#allocation7], %s2138_s24  ;;  %s2647_s14 = smov (!%p466_p9, %s2039_s14), 1 }
  0x46   : > { %v509_v15 = vld [vmem:[%s2175_s26] sm:$0x1]  ;;  %v510_v18 = vld [vmem:[%s2175_s26 + $0x2] sm:$0x1]  ;;  %s1937_s27 = sshll.u32 %s2647_s14, 4 }
  0x47   : > { %v519_v28 = vld.sshfl [vmem:[#allocation1] sm:$0xff pattern:$0x73625140]  ;;  %s2592_s30 = scalar_lea.vmem %s2622_s3, %s1937_s27 }
  0x48   : > { %v524_v29 = vld.sshfl [vmem:[#allocation1 + $0x20] sm:$0xff pattern:$0x73625140]  ;;  %527 = vst [vmem:[#allocation1] ss:$4 sm:$0xff] %v495_v26  ;;  %v550_v57 = vunpack.c.l.b16 %v519_v28 }
  0x49   : > { %531 = vst [vmem:[#allocation1 + $0x20] ss:$4 sm:$0xff] %v496_v27  ;;  %v551_v50 = vunpack.c.l.b16 %v524_v29 }
  0x4b   : > { %v558_v58 = vrot.slane %v551_v50, 7  ;;  %v516_v50 = vld [vmem:[%s2175_s26 + $0xe] sm:$0x1] }
  0x4d   : > { %v560_v3 = vsel %vm559_vm0, %v558_v58, %v550_v57  ;;  %v816_v57 = vld [vmem:[%s2141_s25 + $0x4] sm:$0x1]  ;;  %v817_v58 = vld [vmem:[%s2141_s25 + $0x6] sm:$0x1] }
  0x4f   : > { %v528_v32 = vld.sshfl [vmem:[#allocation1] sm:$0xff pattern:$0x73625140] }
  0x50   : > { %v532_v33 = vld.sshfl [vmem:[#allocation1 + $0x20] sm:$0xff pattern:$0x73625140]  ;;  %535 = vst [vmem:[#allocation1] ss:$4 sm:$0xff] %v497_v30  ;;  %v552_v55 = vunpack.c.l.b16 %v528_v32 }
  0x51   : > { %539 = vst [vmem:[#allocation1 + $0x20] ss:$4 sm:$0xff] %v498_v31  ;;  %v553_v62 = vunpack.c.l.b16 %v532_v33 }
  0x52   : > { %v561_v0 = vrot.slane %v552_v55, 6 }
  0x53   : > { %v564_v9 = vrot.slane %v553_v62, 5  ;;  %v819_v62 = vld [vmem:[%s2141_s25 + $0xa] sm:$0x1] }
  0x54   : > { %v563_v11 = vsel %vm562_vm1, %v561_v0, %v560_v3 }
  0x55   : > { %v566_v17 = vsel %vm565_vm2, %v564_v9, %v563_v11  ;;  %v824_v9 = vld [vmem:[%s2154_s12 + $0x4] sm:$0x1] }
  0x57   : > { %v536_v36 = vld.sshfl [vmem:[#allocation1] sm:$0xff pattern:$0x73625140] }
  0x58   : > { %v2151_v37 = vld.sshfl [vmem:[#allocation1 + $0x20] sm:$0xff pattern:$0x73625140]  ;;  %543 = vst [vmem:[#allocation1] ss:$4 sm:$0xff] %v499_v34  ;;  %v554_v7 = vunpack.c.l.b16 %v536_v36 }
  0x59   : > { %547 = vst [vmem:[#allocation1 + $0x20] ss:$4 sm:$0xff] %v500_v35  ;;  %v555_v13 = vunpack.c.l.b16 %v2151_v37  ;;  %v511_v34 = vld [vmem:[%s2175_s26 + $0x4] sm:$0x1]  ;;  %v512_v37 = vld [vmem:[%s2175_s26 + $0x6] sm:$0x1] }
  0x5a   : > { %v567_v14 = vrot.slane %v554_v7, 4 }
  0x5b   : > { %v570_v22 = vrot.slane %v555_v13, 3  ;;  %v826_v13 = vld [vmem:[%s2154_s12 + $0x8] sm:$0x1] }
  0x5c   : > { %v569_v25 = vsel %vm568_vm3, %v567_v14, %v566_v17 }
  0x5d   : > { %v572_v32 = vsel %vm571_vm4, %v570_v22, %v569_v25 }
  0x5f   : > { %v2158_v40 = vld.sshfl [vmem:[#allocation1] sm:$0xff pattern:$0x73625140] }
  0x60   : > { %v2160_v41 = vld.sshfl [vmem:[#allocation1 + $0x20] sm:$0xff pattern:$0x73625140]  ;;  %581 = vst [vmem:[#allocation1] ss:$4 sm:$0xff] %v501_v38  ;;  %v556_v20 = vunpack.c.l.b16 %v2158_v40 }
  0x61   : > { %586 = vst [vmem:[#allocation1 + $0x20] ss:$4 sm:$0xff] %v502_v39  ;;  %v557_v28 = vunpack.c.l.b16 %v2160_v41 }
  0x62   : > { %v573_v30 = vrot.slane %v556_v20, 2 }
  0x63   : > { %v576_v36 = vrot.slane %v557_v28, 1 }
  0x64   : > { %v575_v39 = vsel %vm574_vm5, %v573_v30, %v572_v32  ;;  %v829_v30 = vld [vmem:[%s2154_s12 + $0xe] sm:$0x1] }
  0x67   : > { %v582_v44 = vld.sshfl [vmem:[#allocation1] sm:$0xff pattern:$0x73625140] }
  0x68   : > { %v587_v45 = vld.sshfl [vmem:[#allocation1 + $0x20] sm:$0xff pattern:$0x73625140]  ;;  %590 = vst [vmem:[#allocation1] ss:$4 sm:$0xff] %v503_v42  ;;  %v613_v53 = vunpack.c.l.b16 %v582_v44 }
  0x69   : > { %594 = vst [vmem:[#allocation1 + $0x20] ss:$4 sm:$0xff] %v504_v43  ;;  %v614_v47 = vunpack.c.l.b16 %v587_v45  ;;  %v578_v43 = vsel %vm577_vm6, %v576_v36, %v575_v39  ;;  %v513_v45 = vld [vmem:[%s2175_s26 + $0x8] sm:$0x1] }
  0x6a   : > { %v579_v44 = vpack.c.b16 %v578_v43, %v578_v43 }
  0x6b   : > { %v621_v54 = vrot.slane %v614_v47, 7 }
  0x6d   : > { %v622_v61 = vsel %vm559_vm0, %v621_v54, %v613_v53  ;;  %v814_v53 = vld [vmem:[%s2141_s25] sm:$0x1]  ;;  %v815_v54 = vld [vmem:[%s2141_s25 + $0x2] sm:$0x1] }
  0x6f   : > { %v591_v49 = vld.sshfl [vmem:[#allocation1] sm:$0xff pattern:$0x73625140] }
  0x70   : > { %v595_v51 = vld.sshfl [vmem:[#allocation1 + $0x20] sm:$0xff pattern:$0x73625140]  ;;  %598 = vst [vmem:[#allocation1] ss:$4 sm:$0xff] %v505_v46  ;;  %v615_v52 = vunpack.c.l.b16 %v591_v49 }
  0x71   : > { %602 = vst [vmem:[#allocation1 + $0x20] ss:$4 sm:$0xff] %v506_v48  ;;  %v616_v56 = vunpack.c.l.b16 %v595_v51  ;;  %v514_v46 = vld [vmem:[%s2175_s26 + $0xa] sm:$0x1]  ;;  %v515_v49 = vld [vmem:[%s2175_s26 + $0xc] sm:$0x1] }
  0x72   : > { %v623_v59 = vrot.slane %v615_v52, 6 }
  0x73   : > { %v625_v2 = vrot.slane %v616_v56, 5 }
  0x74   : > { %v624_v6 = vsel %vm562_vm1, %v623_v59, %v622_v61  ;;  %v818_v61 = vld [vmem:[%s2141_s25 + $0x8] sm:$0x1] }
  0x75   : > { %v626_v12 = vsel %vm565_vm2, %v625_v2, %v624_v6  ;;  %v821_v2 = vld [vmem:[%s2141_s25 + $0xe] sm:$0x1]  ;;  %v823_v6 = vld [vmem:[%s2154_s12 + $0x2] sm:$0x1] }
  0x77   : > { %v599_v1 = vld.sshfl [vmem:[#allocation1] sm:$0xff pattern:$0x73625140] }
  0x78   : > { %v603_v4 = vld.sshfl [vmem:[#allocation1 + $0x20] sm:$0xff pattern:$0x73625140]  ;;  %606 = vst [vmem:[#allocation1] ss:$4 sm:$0xff] %v507_v60  ;;  %v617_v5 = vunpack.c.l.b16 %v599_v1 }
  0x79   : > { %610 = vst [vmem:[#allocation1 + $0x20] ss:$4 sm:$0xff] %v508_v63  ;;  %v618_v8 = vunpack.c.l.b16 %v603_v4  ;;  %v820_v1 = vld [vmem:[%s2141_s25 + $0xc] sm:$0x1] }
  0x7a   : > { %v627_v10 = vrot.slane %v617_v5, 4  ;;  %v822_v5 = vld [vmem:[%s2154_s12] sm:$0x1] }
  0x7b   : > { %v629_v16 = vrot.slane %v618_v8, 3 }
  0x7c   : > { %v628_v19 = vsel %vm568_vm3, %v627_v10, %v626_v12  ;;  %v825_v10 = vld [vmem:[%s2154_s12 + $0x6] sm:$0x1] }
  0x7d   : > { %v630_v27 = vsel %vm571_vm4, %v629_v16, %v628_v19 }
  0x7f   : > { %v607_v21 = vld.sshfl [vmem:[#allocation1] sm:$0xff pattern:$0x73625140] }
  0x80   : > { %v611_v23 = vld.sshfl [vmem:[#allocation1 + $0x20] sm:$0xff pattern:$0x73625140]  ;;  %v619_v24 = vunpack.c.l.b16 %v607_v21  ;;  %689 = vst [vmem:[#allocation1] ss:$4 sm:$0xff] %v509_v15 }
  0x81   : > { %v620_v26 = vunpack.c.l.b16 %v611_v23  ;;  %694 = vst [vmem:[#allocation1 + $0x20] ss:$4 sm:$0xff] %v510_v18  ;;  %v827_v15 = vld [vmem:[%s2154_s12 + $0xa] sm:$0x1] }
  0x82   : > { %v631_v29 = vrot.slane %v619_v24, 2 }
  0x83   : > { %v633_v31 = vrot.slane %v620_v26, 1 }
  0x84   : > { %v632_v33 = vsel %vm574_vm5, %v631_v29, %v630_v27  ;;  %v828_v27 = vld [vmem:[%s2154_s12 + $0xc] sm:$0x1] }
  0x85   : > { %v634_v35 = vsel %vm577_vm6, %v633_v31, %v632_v33 }
  0x86   : > { %v635_v38 = vpack.c.b16 %v634_v35, %v634_v35 }
  0x87   : > { %v2191_v40 = vld.sshfl [vmem:[#allocation1] sm:$0xff pattern:$0x73625140] }
  0x88   : > { %v641_v41 = vsel %vm488_vm7, %v635_v38, 0  ;;  %v2194_v42 = vld.sshfl [vmem:[#allocation1 + $0x20] sm:$0xff pattern:$0x73625140]  ;;  %698 = vst [vmem:[#allocation1] ss:$4 sm:$0xff] %v511_v34 }
  0x89   : > { %650 = vmatpush.bf16.xpose.msra.mxu0 %v641_v41  ;;  %702 = vst [vmem:[#allocation1 + $0x20] ss:$4 sm:$0xff] %v512_v37 }
  0x8f   : > { %v2199_v47 = vld.sshfl [vmem:[#allocation1] sm:$0xff pattern:$0x73625140] }
  0x90   : > { %v2201_v48 = vld.sshfl [vmem:[#allocation1 + $0x20] sm:$0xff pattern:$0x73625140]  ;;  %706 = vst [vmem:[#allocation1] ss:$4 sm:$0xff] %v513_v45  ;;  %1924 = vmatmul.msk.bf16.vlgmr.msra.gmra.mxu0 %vm488_vm7, %v579_v44 }
  0x91   : > { %710 = vst [vmem:[#allocation1 + $0x20] ss:$4 sm:$0xff] %v514_v46 }
  0x97   : > { %v2206_v51 = vld.sshfl [vmem:[#allocation1] sm:$0xff pattern:$0x73625140] }
  0x98   : > { %v2208_v52 = vld.sshfl [vmem:[#allocation1 + $0x20] sm:$0xff pattern:$0x73625140]  ;;  %714 = vst [vmem:[#allocation1] ss:$4 sm:$0xff] %v515_v49 }
  0x99   : > { %718 = vst [vmem:[#allocation1 + $0x20] ss:$4 sm:$0xff] %v516_v50  ;;  %v830_v50 = vld [vmem:[%s2175_s26] sm:$0x1] }
  0x9f   : > { %v2212_v55 = vld.sshfl [vmem:[#allocation1] sm:$0xff pattern:$0x73625140] }
  0xa0   : > { %v2214_v56 = vld.sshfl [vmem:[#allocation1 + $0x20] sm:$0xff pattern:$0x73625140]  ;;  %839 = vst [vmem:[#allocation1] ss:$4 sm:$0xff] %v814_v53 }
  0xa1   : > { %844 = vst [vmem:[#allocation1 + $0x20] ss:$4 sm:$0xff] %v815_v54 }
  0xa7   : > { %v840_v59 = vld.sshfl [vmem:[#allocation1] sm:$0xff pattern:$0x73625140] }
  0xa8   : > { %v845_v60 = vld.sshfl [vmem:[#allocation1 + $0x20] sm:$0xff pattern:$0x73625140]  ;;  %848 = vst [vmem:[#allocation1] ss:$4 sm:$0xff] %v816_v57  ;;  %v871_v17 = vunpack.c.l.b16 %v840_v59 }
  0xa9   : > { %852 = vst [vmem:[#allocation1 + $0x20] ss:$4 sm:$0xff] %v817_v58  ;;  %v872_v24 = vunpack.c.l.b16 %v845_v60  ;;  %v831_v57 = vld [vmem:[%s2175_s26 + $0x2] sm:$0x1] }
  0xaa   : > { %v879_v25 = vrot.slane %v871_v17, 1 }
  0xac   : > { %v880_v34 = vsel %vm559_vm0, %v872_v24, %v879_v25  ;;  %v836_v24 = vld [vmem:[%s2175_s26 + $0xc] sm:$0x1]  ;;  %v837_v25 = vld [vmem:[%s2175_s26 + $0xe] sm:$0x1] }
  0xaf   : > { %v849_v63 = vld.sshfl [vmem:[#allocation1] sm:$0xff pattern:$0x73625140] }
  0xb0   : > { %v853_v0 = vld.sshfl [vmem:[#allocation1 + $0x20] sm:$0xff pattern:$0x73625140]  ;;  %856 = vst [vmem:[#allocation1] ss:$4 sm:$0xff] %v818_v61  ;;  %v873_v22 = vunpack.c.l.b16 %v849_v63 }
  0xb1   : > { %860 = vst [vmem:[#allocation1 + $0x20] ss:$4 sm:$0xff] %v819_v62  ;;  %v874_v29 = vunpack.c.l.b16 %v853_v0 }
  0xb2   : > { %v881_v31 = vrot.slane %v873_v22, 7 }
  0xb3   : > { %v883_v41 = vrot.slane %v874_v29, 6  ;;  %v1130_v29 = vld [vmem:[%s2141_s25 + $0x2] sm:$0x2] }
  0xb4   : > { %v882_v44 = vsel %vm562_vm1, %v881_v31, %v880_v34 }
  0xb5   : > { %v884_v54 = vsel %vm565_vm2, %v883_v41, %v882_v44  ;;  %v1135_v44 = vld [vmem:[%s2141_s25 + $0xc] sm:$0x2] }
  0xb7   : > { %v857_v3 = vld.sshfl [vmem:[#allocation1] sm:$0xff pattern:$0x73625140] }
  0xb8   : > { %v861_v4 = vld.sshfl [vmem:[#allocation1 + $0x20] sm:$0xff pattern:$0x73625140]  ;;  %864 = vst [vmem:[#allocation1] ss:$4 sm:$0xff] %v820_v1  ;;  %v875_v38 = vunpack.c.l.b16 %v857_v3 }
  0xb9   : > { %868 = vst [vmem:[#allocation1 + $0x20] ss:$4 sm:$0xff] %v821_v2  ;;  %v876_v46 = vunpack.c.l.b16 %v861_v4 }
  0xba   : > { %v885_v49 = vrot.slane %v875_v38, 5  ;;  %v1134_v38 = vld [vmem:[%s2141_s25 + $0xa] sm:$0x2] }
  0xbb   : > { %v887_v61 = vrot.slane %v876_v46, 4  ;;  %v1136_v46 = vld [vmem:[%s2141_s25 + $0xe] sm:$0x2] }
  0xbc   : > { %v886_v0 = vsel %vm568_vm3, %v885_v49, %v884_v54  ;;  %v1138_v54 = vld [vmem:[%s2154_s12 + $0x2] sm:$0x2] }
  0xbf   : > { %v2224_v7 = vld.sshfl [vmem:[#allocation1] sm:$0xff pattern:$0x73625140] }
  0xc0   : > { %v2226_v8 = vld.sshfl [vmem:[#allocation1 + $0x20] sm:$0xff pattern:$0x73625140]  ;;  %895 = vst [vmem:[#allocation1] ss:$4 sm:$0xff] %v822_v5  ;;  %v877_v59 = vunpack.c.l.b16 %v2224_v7  ;;  %v888_v7 = vsel %vm571_vm4, %v887_v61, %v886_v0 }
  0xc1   : > { %900 = vst [vmem:[#allocation1 + $0x20] ss:$4 sm:$0xff] %v823_v6  ;;  %v878_v3 = vunpack.c.l.b16 %v2226_v8  ;;  %v1142_v0 = vld [vmem:[%s2154_s12 + $0xa] sm:$0x2] }
  0xc2   : > { %v889_v5 = vrot.slane %v877_v59, 3  ;;  %v1139_v59 = vld [vmem:[%s2154_s12 + $0x4] sm:$0x2] }
  0xc7   : > { %v896_v11 = vld.sshfl [vmem:[#allocation1] sm:$0xff pattern:$0x73625140] }
  0xc8   : > { %v901_v12 = vld.sshfl [vmem:[#allocation1 + $0x20] sm:$0xff pattern:$0x73625140]  ;;  %904 = vst [vmem:[#allocation1] ss:$4 sm:$0xff] %v824_v9  ;;  %v927_v14 = vunpack.c.l.b16 %v896_v11 }
  0xc9   : > { %908 = vst [vmem:[#allocation1 + $0x20] ss:$4 sm:$0xff] %v825_v10  ;;  %v928_v20 = vunpack.c.l.b16 %v901_v12  ;;  %v832_v10 = vld [vmem:[%s2175_s26 + $0x4] sm:$0x1]  ;;  %v891_v12 = vrot.slane %v878_v3, 2 }
  0xca   : > { %v935_v21 = vrot.slane %v927_v14, 1  ;;  %v1143_v3 = vld [vmem:[%s2154_s12 + $0xc] sm:$0x2] }
  0xcc   : > { %v936_v28 = vsel %vm559_vm0, %v928_v20, %v935_v21  ;;  %v834_v20 = vld [vmem:[%s2175_s26 + $0x8] sm:$0x1]  ;;  %v835_v21 = vld [vmem:[%s2175_s26 + $0xa] sm:$0x1] }
  0xcf   : > { %v905_v16 = vld.sshfl [vmem:[#allocation1] sm:$0xff pattern:$0x73625140] }
  0xd0   : > { %v909_v18 = vld.sshfl [vmem:[#allocation1 + $0x20] sm:$0xff pattern:$0x73625140]  ;;  %912 = vst [vmem:[#allocation1] ss:$4 sm:$0xff] %v826_v13  ;;  %v929_v19 = vunpack.c.l.b16 %v905_v16 }
  0xd1   : > { %916 = vst [vmem:[#allocation1 + $0x20] ss:$4 sm:$0xff] %v827_v15  ;;  %v930_v23 = vunpack.c.l.b16 %v909_v18  ;;  %v833_v13 = vld [vmem:[%s2175_s26 + $0x6] sm:$0x1]  ;;  %v890_v15 = vsel %vm574_vm5, %v889_v5, %v888_v7  ;;  %v1145_v7 = vld [vmem:[%s2175_s26] sm:$0x2] }
  0xd2   : > { %v937_v26 = vrot.slane %v929_v19, 7  ;;  %v892_v18 = vsel %vm577_vm6, %v891_v12, %v890_v15  ;;  %v1147_v12 = vld [vmem:[%s2175_s26 + $0x4] sm:$0x2] }
  0xd3   : > { %v939_v33 = vrot.slane %v930_v23, 6  ;;  %v893_v19 = vpack.c.b16 %v892_v18, %v892_v18  ;;  %v1150_v18 = vld [vmem:[%s2175_s26 + $0xa] sm:$0x2] }
  0xd4   : > { %v938_v37 = vsel %vm562_vm1, %v937_v26, %v936_v28  ;;  %v1129_v28 = vld [vmem:[%s2141_s25] sm:$0x2] }
  0xd5   : > { %v940_v45 = vsel %vm565_vm2, %v939_v33, %v938_v37  ;;  %v1132_v33 = vld [vmem:[%s2141_s25 + $0x6] sm:$0x2] }
  0xd7   : > { %v913_v32 = vld.sshfl [vmem:[#allocation1] sm:$0xff pattern:$0x73625140] }
  0xd8   : > { %v917_v35 = vld.sshfl [vmem:[#allocation1 + $0x20] sm:$0xff pattern:$0x73625140]  ;;  %920 = vst [vmem:[#allocation1] ss:$4 sm:$0xff] %v828_v27  ;;  %v931_v36 = vunpack.c.l.b16 %v913_v32 }
  0xd9   : > { %924 = vst [vmem:[#allocation1 + $0x20] ss:$4 sm:$0xff] %v829_v30  ;;  %v932_v39 = vunpack.c.l.b16 %v917_v35  ;;  %v1131_v32 = vld [vmem:[%s2141_s25 + $0x4] sm:$0x2] }
  0xda   : > { %v941_v43 = vrot.slane %v931_v36, 5  ;;  %v1133_v36 = vld [vmem:[%s2141_s25 + $0x8] sm:$0x2] }
  0xdb   : > { %v943_v53 = vrot.slane %v932_v39, 4 }
  0xdc   : > { %v942_v58 = vsel %vm568_vm3, %v941_v43, %v940_v45 }
  0xdd   : > { %v944_v2 = vsel %vm571_vm4, %v943_v53, %v942_v58  ;;  %v1137_v53 = vld [vmem:[%s2154_s12] sm:$0x2] }
  0xdf   : > { %v921_v60 = vld.sshfl [vmem:[#allocation1] sm:$0xff pattern:$0x73625140] }
  0xe0   : > { %v925_v62 = vld.sshfl [vmem:[#allocation1 + $0x20] sm:$0xff pattern:$0x73625140]  ;;  %v933_v63 = vunpack.c.l.b16 %v921_v60  ;;  %1004 = vst [vmem:[#allocation1] ss:$4 sm:$0xff] %v830_v50 }
  0xe1   : > { %v934_v1 = vunpack.c.l.b16 %v925_v62  ;;  %1009 = vst [vmem:[#allocation1 + $0x20] ss:$4 sm:$0xff] %v831_v57  ;;  %v1140_v60 = vld [vmem:[%s2154_s12 + $0x6] sm:$0x2] }
  0xe2   : > { %v945_v4 = vrot.slane %v933_v63, 3  ;;  %v1141_v63 = vld [vmem:[%s2154_s12 + $0x8] sm:$0x2] }
  0xe3   : > { %v947_v6 = vrot.slane %v934_v1, 2 }
  0xe4   : > { %v946_v9 = vsel %vm574_vm5, %v945_v4, %v944_v2  ;;  %v1144_v4 = vld [vmem:[%s2154_s12 + $0xe] sm:$0x2] }
  0xe5   : > { %v948_v11 = vsel %vm577_vm6, %v947_v6, %v946_v9  ;;  %v1146_v9 = vld [vmem:[%s2175_s26 + $0x2] sm:$0x2] }
  0xe6   : > { %v949_v14 = vpack.c.b16 %v948_v11, %v948_v11 }
  0xe7   : > { %v2253_v16 = vld.sshfl [vmem:[#allocation1] sm:$0xff pattern:$0x73625140] }
  0xe8   : > { %v954_v8 = vsel %vm488_vm7, %v949_v14, 0  ;;  %v2256_v17 = vld.sshfl [vmem:[#allocation1 + $0x20] sm:$0xff pattern:$0x73625140]  ;;  %1013 = vst [vmem:[#allocation1] ss:$4 sm:$0xff] %v832_v10 }
  0xe9   : > { %963 = vmatpush.bf16.xpose.msra.mxu2 %v954_v8  ;;  %1017 = vst [vmem:[#allocation1 + $0x20] ss:$4 sm:$0xff] %v833_v13  ;;  %v1148_v13 = vld [vmem:[%s2175_s26 + $0x6] sm:$0x2]  ;;  %v1149_v8 = vld [vmem:[%s2175_s26 + $0x8] sm:$0x2] }
  0xef   : > { %v2261_v22 = vld.sshfl [vmem:[#allocation1] sm:$0xff pattern:$0x73625140] }
  0xf0   : > { %v2263_v23 = vld.sshfl [vmem:[#allocation1 + $0x20] sm:$0xff pattern:$0x73625140]  ;;  %1021 = vst [vmem:[#allocation1] ss:$4 sm:$0xff] %v834_v20  ;;  %1926 = vmatmul.msk.bf16.vlgmr.msra.gmra.mxu2 %vm488_vm7, %v893_v19 }
  0xf1   : > { %1025 = vst [vmem:[#allocation1 + $0x20] ss:$4 sm:$0xff] %v835_v21  ;;  %v2049_v21 = vmov -inf  }
  0xf2   : > { %480 = vst.msk [vmem:[#allocation2] sm:$0xff] %vm479_vm8, %v2049_v21 }
  0xf3   : > { %481 = vst.msk [vmem:[#allocation2 + $0x8] sm:$0xff] %vm479_vm8, %v2049_v21 }
  0xf4   : > { %482 = vst.msk [vmem:[#allocation2 + $0x10] sm:$0xff] %vm479_vm8, %v2049_v21 }
  0xf5   : > { %483 = vst.msk [vmem:[#allocation2 + $0x18] sm:$0xff] %vm479_vm8, %v2049_v21  ;;  %v1452_v21 = vld [vmem:[%s2154_s12] sm:$0x2] }
  0xf7   : > { %v2268_v26 = vld.sshfl [vmem:[#allocation1] sm:$0xff pattern:$0x73625140] }
  0xf8   : > { %v2270_v27 = vld.sshfl [vmem:[#allocation1 + $0x20] sm:$0xff pattern:$0x73625140]  ;;  %1029 = vst [vmem:[#allocation1] ss:$4 sm:$0xff] %v836_v24 }
  0xf9   : > { %1033 = vst [vmem:[#allocation1 + $0x20] ss:$4 sm:$0xff] %v837_v25  ;;  %v1151_v24 = vld [vmem:[%s2175_s26 + $0xc] sm:$0x2] }
  0xff   : > { %v2274_v30 = vld.sshfl [vmem:[#allocation1] sm:$0xff pattern:$0x73625140] }
 0x100   : > { %v2276_v31 = vld.sshfl [vmem:[#allocation1 + $0x20] sm:$0xff pattern:$0x73625140]  ;;  %1154 = vst [vmem:[#allocation1] ss:$4 sm:$0xff] %v1129_v28 }
 0x101   : > { %1159 = vst [vmem:[#allocation1 + $0x20] ss:$4 sm:$0xff] %v1130_v29  ;;  %v1152_v28 = vld [vmem:[%s2175_s26 + $0xe] sm:$0x2] }
 0x107   : > { %v2280_v34 = vld.sshfl [vmem:[#allocation1] sm:$0xff pattern:$0x73625140] }
 0x108   : > { %v2282_v35 = vld.sshfl [vmem:[#allocation1 + $0x20] sm:$0xff pattern:$0x73625140]  ;;  %1163 = vst [vmem:[#allocation1] ss:$4 sm:$0xff] %v1131_v32 }
 0x109   : > { %1167 = vst [vmem:[#allocation1 + $0x20] ss:$4 sm:$0xff] %v1132_v33  ;;  %v1444_v32 = vld [vmem:[%s2141_s25] sm:$0x2] }
 0x10d   : > { %v2285_v37 = vpop.f32.mrf.mxu0 }
 0x10e   : > { %v657_v39 = vsel %vm488_vm7, %v2285_v37, -inf }
 0x10f   : > { %v2290_v41 = vld.sshfl [vmem:[#allocation1] sm:$0xff pattern:$0x73625140]  ;;  %658 = vmax.xlane.f32.xlu0 %v657_v39  ;;  %v2050_v39 = vmov 0  }
 0x110   : > { %v2292_v43 = vld.sshfl [vmem:[#allocation1 + $0x20] sm:$0xff pattern:$0x73625140]  ;;  %1171 = vst [vmem:[#allocation1] ss:$4 sm:$0xff] %v1133_v36  ;;  %1982 = vset.pattern.permute.xlu0 %v2050_v39  ;;  %1983 = vset.pattern.permute.xlu1 %v2050_v39 }
 0x111   : > { %1175 = vst [vmem:[#allocation1 + $0x20] ss:$4 sm:$0xff] %v1134_v38  ;;  %v1445_v36 = vld [vmem:[%s2141_s25 + $0x2] sm:$0x2]  ;;  %1984 = vset.pattern.permute.xlu2 %v2050_v39 }
 0x115   : > { %v654_v45 = vpop.f32.mrf.mxu0 }
 0x116   : > { %v1447_v45 = vld [vmem:[%s2141_s25 + $0x6] sm:$0x2] }
 0x117   : > { %v2296_v49 = vld.sshfl [vmem:[#allocation1] sm:$0xff pattern:$0x73625140] }
 0x118   : > { %v2298_v50 = vld.sshfl [vmem:[#allocation1 + $0x20] sm:$0xff pattern:$0x73625140]  ;;  %1179 = vst [vmem:[#allocation1] ss:$4 sm:$0xff] %v1135_v44 }
 0x119   : > { %1183 = vst [vmem:[#allocation1 + $0x20] ss:$4 sm:$0xff] %v1136_v46  ;;  %v1446_v44 = vld [vmem:[%s2141_s25 + $0x4] sm:$0x2] }
 0x11f   : > { %v2302_v57 = vld.sshfl [vmem:[#allocation1] sm:$0xff pattern:$0x73625140] }
 0x120   : > { %v2304_v58 = vld.sshfl [vmem:[#allocation1 + $0x20] sm:$0xff pattern:$0x73625140]  ;;  %1210 = vst [vmem:[#allocation1] ss:$4 sm:$0xff] %v1137_v53 }
 0x121   : > { %1215 = vst [vmem:[#allocation1 + $0x20] ss:$4 sm:$0xff] %v1138_v54  ;;  %v2051_v54 = vmov 0.0  }
 0x122   : > { %489 = vst.msk [vmem:[#allocation4] sm:$0xff] %vm488_vm7, %v2051_v54 }
 0x123   : > { %484 = vst.msk [vmem:[#allocation3] sm:$0xff] %vm479_vm8, %v2051_v54 }
 0x124   : > { %485 = vst.msk [vmem:[#allocation3 + $0x8] sm:$0xff] %vm479_vm8, %v2051_v54 }
 0x125   : > { %486 = vst.msk [vmem:[#allocation3 + $0x10] sm:$0xff] %vm479_vm8, %v2051_v54 }
 0x126   : > { %487 = vst.msk [vmem:[#allocation3 + $0x18] sm:$0xff] %vm479_vm8, %v2051_v54 }
 0x127   : > { %v2308_v61 = vld.sshfl [vmem:[#allocation1] sm:$0xff pattern:$0x73625140]  ;;  %490 = vst.msk [vmem:[#allocation4 + $0x8] sm:$0xff] %vm488_vm7, %v2051_v54 }
 0x128   : > { %v2310_v62 = vld.sshfl [vmem:[#allocation1 + $0x20] sm:$0xff pattern:$0x73625140]  ;;  %1219 = vst [vmem:[#allocation1] ss:$4 sm:$0xff] %v1139_v59 }
 0x129   : > { %1223 = vst [vmem:[#allocation1 + $0x20] ss:$4 sm:$0xff] %v1140_v60  ;;  %v1448_v59 = vld [vmem:[%s2141_s25 + $0x8] sm:$0x2]  ;;  %v1449_v60 = vld [vmem:[%s2141_s25 + $0xa] sm:$0x2] }
 0x12a   : > { %491 = vst.msk [vmem:[#allocation4 + $0x10] sm:$0xff] %vm488_vm7, %v2051_v54 }
 0x12b   : > { %492 = vst.msk [vmem:[#allocation4 + $0x18] sm:$0xff] %vm488_vm7, %v2051_v54  ;;  %v1454_v54 = vld [vmem:[%s2154_s12 + $0x4] sm:$0x2] }
 0x12f   : > { %v2314_v1 = vld.sshfl [vmem:[#allocation1] sm:$0xff pattern:$0x73625140] }
 0x130   : > { %v2316_v2 = vld.sshfl [vmem:[#allocation1 + $0x20] sm:$0xff pattern:$0x73625140]  ;;  %1227 = vst [vmem:[#allocation1] ss:$4 sm:$0xff] %v1141_v63 }
 0x131   : > { %1231 = vst [vmem:[#allocation1 + $0x20] ss:$4 sm:$0xff] %v1142_v0 }
 0x137   : > { %v2320_v5 = vld.sshfl [vmem:[#allocation1] sm:$0xff pattern:$0x73625140] }
 0x138   : > { %v2322_v6 = vld.sshfl [vmem:[#allocation1 + $0x20] sm:$0xff pattern:$0x73625140]  ;;  %1235 = vst [vmem:[#allocation1] ss:$4 sm:$0xff] %v1143_v3 }
 0x139   : > { %1239 = vst [vmem:[#allocation1 + $0x20] ss:$4 sm:$0xff] %v1144_v4 }
 0x13f   : > { %v2326_v10 = vld.sshfl [vmem:[#allocation1] sm:$0xff pattern:$0x73625140] }
 0x140   : > { %v2328_v11 = vld.sshfl [vmem:[#allocation1 + $0x20] sm:$0xff pattern:$0x73625140]  ;;  %1319 = vst [vmem:[#allocation1] ss:$4 sm:$0xff] %v1145_v7 }
 0x141   : > { %1324 = vst [vmem:[#allocation1 + $0x20] ss:$4 sm:$0xff] %v1146_v9  ;;  %v1450_v7 = vld [vmem:[%s2141_s25 + $0xc] sm:$0x2]  ;;  %v1451_v9 = vld [vmem:[%s2141_s25 + $0xe] sm:$0x2] }
 0x147   : > { %v2332_v14 = vld.sshfl [vmem:[#allocation1] sm:$0xff pattern:$0x73625140] }
 0x148   : > { %2624 = vst [vmem:[#allocation8_spill] sm:$0xff] %v2332_v14  ;;  %v2334_v15 = vld.sshfl [vmem:[#allocation1 + $0x20] sm:$0xff pattern:$0x73625140] }
 0x149   : > { %2625 = vst [vmem:[#allocation9_spill] sm:$0xff] %v2334_v15 }
 0x14a   : > { %1328 = vst [vmem:[#allocation1] ss:$4 sm:$0xff] %v1147_v12 }
 0x14b   : > { %1332 = vst [vmem:[#allocation1 + $0x20] ss:$4 sm:$0xff] %v1148_v13 }
 0x151   : > { %v2338_v19 = vld.sshfl [vmem:[#allocation1] sm:$0xff pattern:$0x73625140] }
 0x152   : > { %2626 = vst [vmem:[#allocation10_spill] sm:$0xff] %v2338_v19  ;;  %v2340_v20 = vld.sshfl [vmem:[#allocation1 + $0x20] sm:$0xff pattern:$0x73625140] }
 0x153   : > { %2627 = vst [vmem:[#allocation11_spill] sm:$0xff] %v2340_v20  ;;  %v1459_v19 = vld [vmem:[%s2154_s12 + $0xe] sm:$0x2] }
 0x154   : > { %1336 = vst [vmem:[#allocation1] ss:$4 sm:$0xff] %v1149_v8 }
 0x155   : > { %1340 = vst [vmem:[#allocation1 + $0x20] ss:$4 sm:$0xff] %v1150_v18  ;;  %v656_v18 = vld [vmem:[#allocation2] sm:$0xff] }
 0x15b   : > { %v2345_v25 = vld.sshfl [vmem:[#allocation1] sm:$0xff pattern:$0x73625140] }
 0x15c   : > { %2628 = vst [vmem:[#allocation12_spill] sm:$0xff] %v2345_v25  ;;  %v2349_v29 = vld.sshfl [vmem:[#allocation1 + $0x20] sm:$0xff pattern:$0x73625140] }
 0x15d   : > { %2629 = vst [vmem:[#allocation13_spill] sm:$0xff] %v2349_v29 }
 0x15e   : > { %1344 = vst [vmem:[#allocation1] ss:$4 sm:$0xff] %v1151_v24  ;;  %v1453_v24 = vld [vmem:[%s2154_s12 + $0x2] sm:$0x2] }
 0x15f   : > { %1348 = vst [vmem:[#allocation1 + $0x20] ss:$4 sm:$0xff] %v1152_v28 }
 0x165   : > { %v2353_v33 = vld.sshfl [vmem:[#allocation1] sm:$0xff pattern:$0x73625140] }
 0x166   : > { %2630 = vst [vmem:[#allocation14_spill] sm:$0xff] %v2353_v33  ;;  %v2356_v38 = vld.sshfl [vmem:[#allocation1 + $0x20] sm:$0xff pattern:$0x73625140] }
 0x167   : > { %2631 = vst [vmem:[#allocation15_spill] sm:$0xff] %v2356_v38 }
 0x168   : > { %1469 = vst [vmem:[#allocation1] ss:$4 sm:$0xff] %v1444_v32 }
 0x169   : > { %1474 = vst [vmem:[#allocation1 + $0x20] ss:$4 sm:$0xff] %v1445_v36 }
 0x16f   : > { %v2360_v46 = vld.sshfl [vmem:[#allocation1] sm:$0xff pattern:$0x73625140] }
 0x170   : > { %v2362_v53 = vld.sshfl [vmem:[#allocation1 + $0x20] sm:$0xff pattern:$0x73625140]  ;;  %1478 = vst [vmem:[#allocation1] ss:$4 sm:$0xff] %v1446_v44 }
 0x171   : > { %1482 = vst [vmem:[#allocation1 + $0x20] ss:$4 sm:$0xff] %v1447_v45 }
 0x173   : > { %v2371_v0 = vpop.f32.mrf.mxu2 }
 0x174   : > { %v971_v4 = vsel %vm488_vm7, %v2371_v0, -inf }
 0x175   : > { %972 = vmax.xlane.f32.xlu1 %v971_v4 }
 0x177   : > { %v1479_v63 = vld.sshfl [vmem:[#allocation1] sm:$0xff pattern:$0x73625140] }
 0x178   : > { %v2373_v3 = vld.sshfl [vmem:[#allocation1 + $0x20] sm:$0xff pattern:$0x73625140]  ;;  %1486 = vst [vmem:[#allocation1] ss:$4 sm:$0xff] %v1448_v59  ;;  %v1503_v38 = vunpack.c.l.b16 %v1479_v63 }
 0x179   : > { %1490 = vst [vmem:[#allocation1 + $0x20] ss:$4 sm:$0xff] %v1449_v60  ;;  %v1455_v59 = vld [vmem:[%s2154_s12 + $0x6] sm:$0x2] }
 0x17a   : > { %v1512_v20 = vrot.slane %v1503_v38, 1 }
 0x17b   : > { %v967_v13 = vpop.f32.mrf.mxu2 }
 0x17f   : > { %v2382_v12 = vld.sshfl [vmem:[#allocation1] sm:$0xff pattern:$0x73625140] }
 0x180   : > { %v2384_v8 = vld.sshfl [vmem:[#allocation1 + $0x20] sm:$0xff pattern:$0x73625140]  ;;  %1494 = vst [vmem:[#allocation1] ss:$4 sm:$0xff] %v1450_v7 }
 0x181   : > { %1498 = vst [vmem:[#allocation1 + $0x20] ss:$4 sm:$0xff] %v1451_v9  ;;  %v1456_v9 = vld [vmem:[%s2154_s12 + $0x8] sm:$0x2] }
 0x182   : > { %v659_v28 = vpop.xlane.xlu0 %658 }
 0x183   : > { %v660_v36 = vmax.f32 %v656_v18, %v659_v28  ;;  %v1501_v28 = vunpack.c.l.b16 %v2360_v46 }
 0x185   : > { %v661_v44 = vsub.f32 %v656_v18, %v660_v36  ;;  %766 = vst.msk [vmem:[#allocation2] sm:$0xff] %vm479_vm8, %v660_v36  ;;  %666 = vperm.xlu0 %1982, %v660_v36   ;;  %v1502_v36 = vunpack.c.l.b16 %v2362_v53  ;;  %v1509_v33 = vrot.slane %v1501_v28, 3 }
 0x187   : > { %v2388_v32 = vld.sshfl [vmem:[#allocation1] sm:$0xff pattern:$0x73625140]  ;;  %v662_v45 = vmul.f32 1.442695, %v661_v44  ;;  %v1510_v29 = vrot.slane %v1502_v36, 2  ;;  %v1506_v36 = vunpack.c.l.b16 %v2384_v8 }
 0x188   : > { %v2390_v39 = vld.sshfl [vmem:[#allocation1 + $0x20] sm:$0xff pattern:$0x73625140]  ;;  %1525 = vst [vmem:[#allocation1] ss:$4 sm:$0xff] %v1452_v21 }
 0x189   : > { %1530 = vst [vmem:[#allocation1 + $0x20] ss:$4 sm:$0xff] %v1453_v24  ;;  %1985 = vpow2.f32 %v662_v45  ;;  %v1457_v21 = vld [vmem:[%s2154_s12 + $0xa] sm:$0x2]  ;;  %v1511_v46 = vsel %vm559_vm0, %v1510_v29, %v1509_v33 }
 0x18a   : > { %v1513_v28 = vsel %vm562_vm1, %v1512_v20, %v1511_v46 }
 0x18f   : > { %v1526_v60 = vld.sshfl [vmem:[#allocation1] sm:$0xff pattern:$0x73625140]  ;;  %v2395_v7 = vpop.eup %1985 }
 0x190   : > { %v1531_v4 = vld.sshfl [vmem:[#allocation1 + $0x20] sm:$0xff pattern:$0x73625140]  ;;  %1534 = vst [vmem:[#allocation1] ss:$4 sm:$0xff] %v1454_v54  ;;  %683 = vperm.xlu1 %1983, %v2395_v7   ;;  %v1557_v13 = vunpack.c.l.b16 %v1526_v60 }
 0x191   : > { %1538 = vst [vmem:[#allocation1 + $0x20] ss:$4 sm:$0xff] %v1455_v59  ;;  %v1558_v18 = vunpack.c.l.b16 %v1531_v4  ;;  %v1458_v60 = vld [vmem:[%s2154_s12 + $0xc] sm:$0x2] }
 0x192   : > { %v1565_v54 = vrot.slane %v1557_v13, 3  ;;  %v1505_v13 = vunpack.c.l.b16 %v2382_v12 }
 0x193   : > { %v1566_v59 = vrot.slane %v1558_v18, 2  ;;  %v1504_v18 = vunpack.c.l.b16 %v2373_v3 }
 0x195   : > { %v1567_v4 = vsel %vm559_vm0, %v1566_v59, %v1565_v54  ;;  %v1514_v33 = vsel %vm565_vm2, %v1504_v18, %v1513_v28  ;;  %v723_v28 = vunpack.c.l.b16 %v2199_v47 }
 0x197   : > { %v1535_v24 = vld.sshfl [vmem:[#allocation1] sm:$0xff pattern:$0x73625140] }
 0x198   : > { %v1539_v44 = vld.sshfl [vmem:[#allocation1 + $0x20] sm:$0xff pattern:$0x73625140]  ;;  %1542 = vst [vmem:[#allocation1] ss:$4 sm:$0xff] %v1456_v9  ;;  %v1559_v45 = vunpack.c.l.b16 %v1535_v24 }
 0x199   : > { %1546 = vst [vmem:[#allocation1 + $0x20] ss:$4 sm:$0xff] %v1457_v21  ;;  %v1560_v14 = vunpack.c.l.b16 %v1539_v44  ;;  %v1515_v44 = vrot.slane %v1505_v13, 7 }
 0x19a   : > { %v1568_v25 = vrot.slane %v1559_v45, 1 }
 0x19b   : > { %v1516_v3 = vsel %vm568_vm3, %v1515_v44, %v1514_v33  ;;  %v731_v33 = vrot.slane %v723_v28, 6  ;;  %v1247_v28 = vunpack.c.l.b16 %v2322_v6 }
 0x19c   : > { %v1569_v21 = vsel %vm562_vm1, %v1568_v25, %v1567_v4  ;;  %v1507_v25 = vunpack.c.l.b16 %v2388_v32 }
 0x19d   : > { %v1570_v38 = vsel %vm565_vm2, %v1560_v14, %v1569_v21  ;;  %v1508_v14 = vunpack.c.l.b16 %v2390_v39  ;;  %v722_v39 = vunpack.c.l.b16 %v2194_v42 }
 0x19f   : > { %v1543_v15 = vld.sshfl [vmem:[#allocation1] sm:$0xff pattern:$0x73625140]  ;;  %v729_v44 = vrot.slane %v722_v39, 7  ;;  %v1246_v39 = vunpack.c.l.b16 %v2320_v5  ;;  %v1187_v5 = vunpack.c.l.b16 %v2282_v35  ;;  %v1192_v35 = vunpack.c.l.b16 %v2302_v57 }
 0x1a0   : > { %v1547_v53 = vld.sshfl [vmem:[#allocation1 + $0x20] sm:$0xff pattern:$0x73625140]  ;;  %1550 = vst [vmem:[#allocation1] ss:$4 sm:$0xff] %v1458_v60  ;;  %v1561_v9 = vunpack.c.l.b16 %v1543_v15  ;;  %v1519_v60 = vrot.slane %v1507_v25, 5 }
 0x1a1   : > { %1554 = vst [vmem:[#allocation1 + $0x20] ss:$4 sm:$0xff] %v1459_v19  ;;  %v1562_v63 = vunpack.c.l.b16 %v1547_v53  ;;  %v1517_v19 = vrot.slane %v1506_v36, 6  ;;  %v724_v36 = vunpack.c.l.b16 %v2201_v48 }
 0x1a2   : > { %v1571_v24 = vrot.slane %v1561_v9, 7  ;;  %v1521_v9 = vrot.slane %v1508_v14, 4  ;;  %v2441_v14 = vld [vmem:[#allocation2 + $0x8] sm:$0xff] }
 0x1a3   : > { %v1573_v29 = vrot.slane %v1562_v63, 6  ;;  %v1518_v46 = vsel %vm571_vm4, %v1517_v19, %v1516_v3  ;;  %v727_v19 = vunpack.c.l.b16 %v2212_v55 }
 0x1a4   : > { %v1572_v15 = vsel %vm568_vm3, %v1571_v24, %v1570_v38  ;;  %v1520_v13 = vsel %vm574_vm5, %v1519_v60, %v1518_v46  ;;  %v721_v38 = vunpack.c.l.b16 %v2191_v40 }
 0x1a5   : > { %v1574_v20 = vsel %vm571_vm4, %v1573_v29, %v1572_v15  ;;  %v1522_v18 = vsel %vm577_vm6, %v1521_v9, %v1520_v13  ;;  %v725_v29 = vunpack.c.l.b16 %v2206_v51  ;;  %v726_v15 = vunpack.c.l.b16 %v2208_v52 }
 0x1a6   : > { %v1523_v24 = vpack.c.b16 %v1522_v18, %v1522_v18  ;;  %v730_v25 = vsel %vm559_vm0, %v729_v44, %v721_v38  ;;  %v739_v3 = vrot.slane %v727_v19, 2  ;;  %v1242_v9 = vunpack.c.l.b16 %v2308_v61 }
 0x1a7   : > { %v1551_v12 = vld.sshfl [vmem:[#allocation1] sm:$0xff pattern:$0x73625140]  ;;  %v732_v42 = vsel %vm562_vm1, %v731_v33, %v730_v25  ;;  %v735_v47 = vrot.slane %v725_v29, 4  ;;  %v1245_v13 = vunpack.c.l.b16 %v2316_v2  ;;  %v1248_v38 = vunpack.c.l.b16 %v2326_v10 }
 0x1a8   : > { %v1555_v45 = vld.sshfl [vmem:[#allocation1 + $0x20] sm:$0xff pattern:$0x73625140]  ;;  %v1563_v54 = vunpack.c.l.b16 %v1551_v12  ;;  %v733_v12 = vrot.slane %v724_v36, 5  ;;  %v1256_v2 = vrot.slane %v1246_v39, 6  ;;  %v1258_v29 = vrot.slane %v1247_v28, 5 }
 0x1a9   : > { %v1564_v59 = vunpack.c.l.b16 %v1555_v45  ;;  %v728_v45 = vunpack.c.l.b16 %v2214_v56  ;;  %v1254_v61 = vrot.slane %v1245_v13, 7  ;;  %v1260_v33 = vrot.slane %v1248_v38, 4 }
 0x1aa   : > { %v1575_v8 = vrot.slane %v1563_v54, 5  ;;  %v734_v40 = vsel %vm565_vm2, %v733_v12, %v732_v42  ;;  %v737_v54 = vrot.slane %v726_v15, 3  ;;  %v1189_v10 = vunpack.c.l.b16 %v2292_v43 }
 0x1ab   : > { %v1577_v4 = vrot.slane %v1564_v59, 4  ;;  %v736_v48 = vsel %vm568_vm3, %v735_v47, %v734_v40  ;;  %v741_v51 = vrot.slane %v728_v45, 1  ;;  %v1191_v19 = vunpack.c.l.b16 %v2298_v50 }
 0x1ac   : > { %v1576_v53 = vsel %vm574_vm5, %v1575_v8, %v1574_v20  ;;  %v738_v59 = vsel %vm571_vm4, %v737_v54, %v736_v48  ;;  %v1195_v54 = vrot.slane %v1187_v5, 1  ;;  %v1039_v39 = vunpack.c.l.b16 %v2263_v23 }
 0x1ad   : > { %v1578_v32 = vsel %vm577_vm6, %v1577_v4, %v1576_v53  ;;  %v740_v52 = vsel %vm574_vm5, %v739_v3, %v738_v59  ;;  %v1040_v38 = vunpack.c.l.b16 %v2268_v26 }
 0x1ae   : > { %v1579_v21 = vpack.c.b16 %v1578_v32, %v1578_v32  ;;  %v742_v20 = vsel %vm577_vm6, %v741_v51, %v740_v52  ;;  %v1202_v51 = vrot.slane %v1191_v19, 5 }
 0x1af   : > { %v743_v55 = vpack.c.b16 %v742_v20, %v742_v20  ;;  %v1204_v20 = vrot.slane %v1192_v35, 4 }
 0x1b0   : > { %v1584_v63 = vsel %vm488_vm7, %v1579_v21, 0  ;;  %v1243_v21 = vunpack.c.l.b16 %v2310_v62  ;;  %v1186_v62 = vunpack.c.l.b16 %v2280_v34  ;;  %v1188_v34 = vunpack.c.l.b16 %v2290_v41 }
 0x1b1   : > { %1593 = vmatpush.bf16.xpose.msrb.mxu0 %v1584_v63  ;;  %v749_v56 = vsel %vm747_vm9, %v743_v55, 0  ;;  %v1250_v63 = vrot.slane %v1242_v9, 2  ;;  %v1193_v41 = vunpack.c.l.b16 %v2304_v58 }
 0x1b2   : > { %758 = vmatpush.bf16.msra.mxu1 %v749_v56  ;;  %v1251_v18 = vrot.slane %v1243_v21, 1  ;;  %v1194_v45 = vrot.slane %v1186_v62, 2 }
 0x1b4   : > { %v1252_v36 = vsel %vm559_vm0, %v1251_v18, %v1250_v63  ;;  %v1196_v50 = vsel %vm559_vm0, %v1195_v54, %v1194_v45  ;;  %v1036_v63 = vunpack.c.l.b16 %v2253_v16  ;;  %v1038_v18 = vunpack.c.l.b16 %v2261_v22 }
 0x1b5   : > { %v1197_v52 = vsel %vm562_vm1, %v1188_v34, %v1196_v50  ;;  %v1043_v16 = vunpack.c.l.b16 %v2276_v31 }
 0x1b6   : > { %v1044_v28 = vrot.slane %v1036_v63, 1 }
 0x1b8   : > { %1932 = vmatmul.msk.bf16.vlgmr.msrb.gmra.mxu0 %vm488_vm7, %v1523_v24  ;;  %v1244_v24 = vunpack.c.l.b16 %v2314_v1 }
 0x1ba   : > { %v1253_v44 = vsel %vm562_vm1, %v1244_v24, %v1252_v36  ;;  %v1037_v24 = vunpack.c.l.b16 %v2256_v17  ;;  %v672_v36 = vld [vmem:[#allocation3] sm:$0xff] }
 0x1bb   : > { %v1255_v1 = vsel %vm565_vm2, %v1254_v61, %v1253_v44  ;;  %v1041_v61 = vunpack.c.l.b16 %v2270_v27  ;;  %v1048_v44 = vrot.slane %v1039_v39, 6 }
 0x1bc   : > { %v1257_v6 = vsel %vm568_vm3, %v1256_v2, %v1255_v1  ;;  %v1045_v62 = vsel %vm559_vm0, %v1037_v24, %v1044_v28  ;;  %v1042_v2 = vunpack.c.l.b16 %v2274_v30 }
 0x1bd   : > { %v1259_v12 = vsel %vm571_vm4, %v1258_v29, %v1257_v6  ;;  %v1050_v29 = vrot.slane %v1040_v38, 5  ;;  %v1052_v23 = vrot.slane %v1041_v61, 4 }
 0x1be   : > { %v1261_v40 = vsel %vm574_vm5, %v1260_v33, %v1259_v12  ;;  %v673_v33 = vmul.f32 %v2395_v7, %v672_v36  ;;  %v1054_v1 = vrot.slane %v1042_v2, 3 }
 0x1e8   : > { %v973_v8 = vpop.xlane.xlu1 %972 }
 0x1e9   : > { %v2444_v60 = vmax.f32 %v2441_v14, %v973_v8  ;;  %v1206_v8 = vrot.slane %v1193_v41, 3 }
 0x1eb   : > { %v975_v4 = vsub.f32 %v2441_v14, %v2444_v60  ;;  %1080 = vst.msk [vmem:[#allocation2 + $0x8] sm:$0xff] %vm479_vm8, %v2444_v60  ;;  %v1460_v14 = vld [vmem:[%s2175_s26] sm:$0x2] }
 0x1ec   : > { %1634 = vst [vmem:[#allocation1] ss:$4 sm:$0xff] %v1460_v14 }
 0x1f7   : > { %v667_v46 = vpop.permute.xlu0 %666 }
 0x1f8   : > { %v669_v53 = vsub.f32 %v2285_v37, %v667_v46  ;;  %v1249_v37 = vunpack.c.l.b16 %v2328_v11  ;;  %v1190_v11 = vunpack.c.l.b16 %v2296_v49  ;;  %v1198_v49 = vrot.slane %v1189_v10, 7 }
 0x1fa   : > { %v670_v32 = vmul.f32 1.442695, %v669_v53  ;;  %v1262_v15 = vrot.slane %v1249_v37, 3  ;;  %v1200_v3 = vrot.slane %v1190_v11, 6  ;;  %v1199_v57 = vsel %vm565_vm2, %v1198_v49, %v1197_v52 }
 0x1fb   : > { %v1046_v37 = vrot.slane %v1038_v18, 7  ;;  %v1635_v52 = vld.sshfl [vmem:[#allocation1] sm:$0xff pattern:$0x73625140] }
 0x1fc   : > { %1987 = vpow2.f32 %v670_v32  ;;  %v1263_v43 = vsel %vm577_vm6, %v1262_v15, %v1261_v40  ;;  %v1201_v55 = vsel %vm568_vm3, %v1200_v3, %v1199_v57  ;;  %v1056_v15 = vrot.slane %v1043_v16, 2 }
 0x1fd   : > { %v1264_v48 = vpack.c.b16 %v1263_v43, %v1263_v43  ;;  %v1203_v56 = vsel %vm571_vm4, %v1202_v51, %v1201_v55  ;;  %v1047_v22 = vsel %vm562_vm1, %v1046_v37, %v1045_v62  ;;  %v976_v3 = vmul.f32 1.442695, %v975_v4  ;;  %v1462_v4 = vld [vmem:[%s2175_s26 + $0x4] sm:$0x2]  ;;  %v1464_v55 = vld [vmem:[%s2175_s26 + $0x8] sm:$0x2] }
 0x1fe   : > { %v1205_v46 = vsel %vm574_vm5, %v1204_v20, %v1203_v56  ;;  %v1049_v17 = vsel %vm565_vm2, %v1048_v44, %v1047_v22  ;;  %v1463_v20 = vld [vmem:[%s2175_s26 + $0x6] sm:$0x2]  ;;  %1643 = vst [vmem:[#allocation1] ss:$4 sm:$0xff] %v1462_v4  ;;  %v1465_v56 = vld [vmem:[%s2175_s26 + $0xa] sm:$0x2] }
 0x1ff   : > { %v1269_v59 = vsel %vm488_vm7, %v1264_v48, 0  ;;  %v1207_v58 = vsel %vm577_vm6, %v1206_v8, %v1205_v46  ;;  %v1051_v26 = vsel %vm568_vm3, %v1050_v29, %v1049_v17 }
 0x200   : > { %1278 = vmatpush.bf16.xpose.msrb.mxu1 %v1269_v59  ;;  %v1208_v53 = vpack.c.b16 %v1207_v58, %v1207_v58  ;;  %v1053_v5 = vsel %vm571_vm4, %v1052_v23, %v1051_v26  ;;  %v1466_v58 = vld [vmem:[%s2175_s26 + $0xc] sm:$0x2] }
 0x201   : > { %v1055_v30 = vsel %vm574_vm5, %v1054_v1, %v1053_v5 }
 0x202   : > { %v1988_v25 = vpop.eup %1987  ;;  %v684_v13 = vpop.permute.xlu1 %683  ;;  %v1057_v31 = vsel %vm577_vm6, %v1056_v15, %v1055_v30 }
 0x203   : > { %v674_v42 = vsel %vm488_vm7, %v1988_v25, 0.0  ;;  %v687_v47 = vpack.c.bf16 %v1988_v25, %v1988_v25  ;;  %v1058_v10 = vpack.c.b16 %v1057_v31, %v1057_v31  ;;  %v680_v25 = vld [vmem:[#allocation4] sm:$0xff]  ;;  %v2545_v31 = vld [vmem:[#allocation2 + $0x10] sm:$0xff] }
 0x204   : > { %675 = vadd.xlane.f32.xlu1 %v674_v42  ;;  %v686_v7 = vmul.f32 %v684_v13, %v680_v25  ;;  %v1666_v13 = vunpack.c.l.b16 %v1635_v52  ;;  %v987_v25 = vld [vmem:[#allocation3 + $0x8] sm:$0xff] }
 0x205   : > { %1925 = vmatmul.msk.bf16.vlgmr.msra.gmra.mxu1 %vm488_vm7, %v687_v47  ;;  %v1063_v11 = vsel %vm747_vm9, %v1058_v10, 0  ;;  %v1644_v8 = vld.sshfl [vmem:[#allocation1] sm:$0xff pattern:$0x73625140] }
 0x206   : > { %1072 = vmatpush.bf16.msra.mxu3 %v1063_v11  ;;  %1651 = vst [vmem:[#allocation1] ss:$4 sm:$0xff] %v1464_v55  ;;  %v1668_v18 = vunpack.c.l.b16 %v1644_v8  ;;  %v1674_v24 = vrot.slane %v1666_v13, 3  ;;  %v2633_v55 = vld [vmem:[#allocation9_spill] sm:$0xff]  ;;  %v2634_v8 = vld [vmem:[#allocation11_spill] sm:$0xff]  ;;  %v2636_v13 = vld [vmem:[#allocation12_spill] sm:$0xff] }
 0x208   : > { %v1677_v38 = vrot.slane %v1668_v18, 1  ;;  %v2637_v18 = vld [vmem:[#allocation13_spill] sm:$0xff] }
 0x215   : > { %1929 = vmatmul.msk.bf16.vlgmr.msrb.gmra.mxu1 %vm488_vm7, %v1208_v53  ;;  %v1467_v53 = vld [vmem:[%s2175_s26 + $0xe] sm:$0x2] }
 0x21d   : > { %980 = vperm.xlu1 %1983, %v2444_v60   ;;  %v1461_v60 = vld [vmem:[%s2175_s26 + $0x2] sm:$0x2] }
 0x21e   : > { %1639 = vst [vmem:[#allocation1 + $0x20] ss:$4 sm:$0xff] %v1461_v60 }
 0x225   : > { %v1640_v57 = vld.sshfl [vmem:[#allocation1 + $0x20] sm:$0xff pattern:$0x73625140] }
 0x226   : > { %1647 = vst [vmem:[#allocation1 + $0x20] ss:$4 sm:$0xff] %v1463_v20  ;;  %v1667_v63 = vunpack.c.l.b16 %v1640_v57  ;;  %v2632_v20 = vld [vmem:[#allocation8_spill] sm:$0xff] }
 0x227   : > { %v1351_v57 = vunpack.c.l.b16 %v2632_v20 }
 0x228   : > { %v1675_v39 = vrot.slane %v1667_v63, 2  ;;  %v1355_v63 = vunpack.c.l.b16 %v2636_v13 }
 0x22a   : > { %v1676_v61 = vsel %vm559_vm0, %v1675_v39, %v1674_v24  ;;  %v1356_v24 = vunpack.c.l.b16 %v2637_v18 }
 0x22b   : > { %v1678_v44 = vsel %vm562_vm1, %v1677_v38, %v1676_v61  ;;  %v2638_v38 = vld [vmem:[#allocation14_spill] sm:$0xff]  ;;  %v1365_v61 = vrot.slane %v1355_v63, 6 }
 0x22d   : > { %v1648_v46 = vld.sshfl [vmem:[#allocation1 + $0x20] sm:$0xff pattern:$0x73625140] }
 0x22e   : > { %1655 = vst [vmem:[#allocation1 + $0x20] ss:$4 sm:$0xff] %v1465_v56  ;;  %v1669_v37 = vunpack.c.l.b16 %v1648_v46  ;;  %v1352_v56 = vunpack.c.l.b16 %v2633_v55  ;;  %v1354_v46 = vunpack.c.l.b16 %v2634_v8  ;;  %v1310_v55 = vld [vmem:[#allocation4 + $0x10] sm:$0xff] }
 0x230   : > { %v1679_v29 = vsel %vm565_vm2, %v1669_v37, %v1678_v44  ;;  %v1357_v37 = vunpack.c.l.b16 %v2638_v38 }
 0x235   : > { %v2486_v32 = vpop.f32.mrf.mxu0 }
 0x236   : > { %v1601_v9 = vsel %vm488_vm7, %v2486_v32, -inf }
 0x237   : > { %1602 = vmax.xlane.f32.xlu0 %v1601_v9  ;;  %v1652_v9 = vld.sshfl [vmem:[#allocation1] sm:$0xff pattern:$0x73625140] }
 0x238   : > { %1659 = vst [vmem:[#allocation1] ss:$4 sm:$0xff] %v1466_v58  ;;  %v1670_v28 = vunpack.c.l.b16 %v1652_v9  ;;  %v1359_v58 = vrot.slane %v1351_v57, 2  ;;  %v2635_v9 = vld [vmem:[#allocation10_spill] sm:$0xff] }
 0x23a   : > { %v1680_v2 = vrot.slane %v1670_v28, 7  ;;  %v1363_v28 = vrot.slane %v1354_v46, 7 }
 0x23d   : > { %v1597_v21 = vpop.f32.mrf.mxu0 }
 0x23e   : > { %v1656_v21 = vld.sshfl [vmem:[#allocation1 + $0x20] sm:$0xff pattern:$0x73625140] }
 0x23f   : > { %1663 = vst [vmem:[#allocation1 + $0x20] ss:$4 sm:$0xff] %v1467_v53  ;;  %v1671_v36 = vunpack.c.l.b16 %v1656_v21  ;;  %v1660_v62 = vld.sshfl [vmem:[#allocation1] sm:$0xff pattern:$0x73625140]  ;;  %v1360_v53 = vrot.slane %v1352_v56, 1  ;;  %v1353_v21 = vunpack.c.l.b16 %v2635_v9 }
 0x240   : > { %v1672_v22 = vunpack.c.l.b16 %v1660_v62  ;;  %v2639_v62 = vld [vmem:[#allocation15_spill] sm:$0xff] }
 0x241   : > { %v1682_v17 = vrot.slane %v1671_v36, 6  ;;  %v1361_v39 = vsel %vm559_vm0, %v1360_v53, %v1359_v58  ;;  %v1358_v44 = vunpack.c.l.b16 %v2639_v62 }
 0x242   : > { %v1684_v1 = vrot.slane %v1672_v22, 5  ;;  %v1362_v36 = vsel %vm562_vm1, %v1353_v21, %v1361_v39  ;;  %v1625_v39 = vld [vmem:[#allocation4 + $0x18] sm:$0xff] }
 0x246   : > { %v1664_v16 = vld.sshfl [vmem:[#allocation1 + $0x20] sm:$0xff pattern:$0x73625140] }
 0x247   : > { %v1673_v23 = vunpack.c.l.b16 %v1664_v16  ;;  %v1367_v16 = vrot.slane %v1356_v24, 5 }
 0x249   : > { %v1686_v15 = vrot.slane %v1673_v23, 4  ;;  %v1371_v23 = vrot.slane %v1358_v44, 3 }
 0x277   : > { %v676_v27 = vpop.xlane.xlu1 %675 }
 0x278   : > { %v677_v6 = vadd.f32 %v676_v27, %v673_v33  ;;  %v1681_v33 = vsel %vm568_vm3, %v1680_v2, %v1679_v29  ;;  %v1364_v2 = vsel %vm565_vm2, %v1363_v28, %v1362_v36  ;;  %v1369_v29 = vrot.slane %v1357_v37, 4 }
 0x279   : > { %v1683_v26 = vsel %vm571_vm4, %v1682_v17, %v1681_v33  ;;  %v1366_v22 = vsel %vm568_vm3, %v1365_v61, %v1364_v2 }
 0x27a   : > { %679 = vst.msk [vmem:[#allocation3] sm:$0xff] %vm479_vm8, %v677_v6  ;;  %v1685_v27 = vsel %vm574_vm5, %v1684_v1, %v1683_v26  ;;  %v1368_v17 = vsel %vm571_vm4, %v1367_v16, %v1366_v22 }
 0x27b   : > { %v1687_v5 = vsel %vm577_vm6, %v1686_v15, %v1685_v27  ;;  %v1370_v33 = vsel %vm574_vm5, %v1369_v29, %v1368_v17 }
 0x27c   : > { %v1688_v6 = vpack.c.b16 %v1687_v5, %v1687_v5  ;;  %v1372_v26 = vsel %vm577_vm6, %v1371_v23, %v1370_v33 }
 0x27d   : > { %v1373_v1 = vpack.c.b16 %v1372_v26, %v1372_v26 }
 0x27e   : > { %v1693_v30 = vsel %vm747_vm9, %v1688_v6, 0 }
 0x27f   : > { %1702 = vmatpush.bf16.msrb.mxu2 %v1693_v30  ;;  %v1378_v15 = vsel %vm747_vm9, %v1373_v1, 0 }
 0x280   : > { %1387 = vmatpush.bf16.msrb.mxu3 %v1378_v15 }
 0x282   : > { %v760_v12 = vpop.f32.mrf.mxu1 }
 0x283   : > { %v764_v34 = vadd.f32 %v760_v12, %v686_v7 }
 0x285   : > { %765 = vst.msk [vmem:[#allocation4] sm:$0xff] %vm488_vm7, %v764_v34 }
 0x28a   : > { %v762_v19 = vpop.f32.mrf.mxu1 }
 0x28c   : > { %v772_v20 = vld [vmem:[#allocation4] sm:$0xff] }
 0x28f   : > { %v981_v45 = vpop.permute.xlu1 %980 }
 0x290   : > { %v983_v42 = vsub.f32 %v2371_v0, %v981_v45  ;;  %v2516_v0 = vld [vmem:[#allocation2 + $0x18] sm:$0xff] }
 0x292   : > { %v984_v47 = vmul.f32 1.442695, %v983_v42  ;;  %v2510_v40 = vpop.f32.mrf.mxu1 }
 0x293   : > { %v1286_v35 = vsel %vm488_vm7, %v2510_v40, -inf }
 0x294   : > { %1989 = vpow2.f32 %v984_v47  ;;  %1287 = vmax.xlane.f32.xlu2 %v1286_v35 }
 0x295   : > { %1991 = vpow2.f32 %v976_v3 }
 0x29a   : > { %v1990_v43 = vpop.eup %1989  ;;  %v1282_v54 = vpop.f32.mrf.mxu1 }
 0x29b   : > { %v989_v49 = vsel %vm488_vm7, %v1990_v43, 0.0  ;;  %v1002_v48 = vpack.c.bf16 %v1990_v43, %v1990_v43  ;;  %v1992_v59 = vpop.eup %1991 }
 0x29c   : > { %990 = vadd.xlane.f32.xlu0 %v989_v49  ;;  %v988_v12 = vmul.f32 %v1992_v59, %v987_v25  ;;  %v995_v49 = vld [vmem:[#allocation4 + $0x8] sm:$0xff]  ;;  %v1617_v25 = vld [vmem:[#allocation3 + $0x18] sm:$0xff] }
 0x29d   : > { %1927 = vmatmul.msk.bf16.vlgmr.msra.gmra.mxu3 %vm488_vm7, %v1002_v48 }
 0x2aa   : > { %v1603_v41 = vpop.xlane.xlu0 %1602 }
 0x2ab   : > { %v2522_v50 = vmax.f32 %v2516_v0, %v1603_v41 }
 0x2ad   : > { %v1605_v51 = vsub.f32 %v2516_v0, %v2522_v50  ;;  %1710 = vst.msk [vmem:[#allocation2 + $0x18] sm:$0xff] %vm479_vm8, %v2522_v50  ;;  %1610 = vperm.xlu1 %1983, %v2522_v50  }
 0x2af   : > { %v1606_v27 = vmul.f32 1.442695, %v1605_v51 }
 0x2b0   : > { %998 = vperm.xlu0 %1982, %v1992_v59  }
 0x307   : > { %v1288_v10 = vpop.xlane.xlu2 %1287 }
 0x308   : > { %v2548_v11 = vmax.f32 %v2545_v31, %v1288_v10 }
 0x30a   : > { %v1290_v7 = vsub.f32 %v2545_v31, %v2548_v11  ;;  %1395 = vst.msk [vmem:[#allocation2 + $0x10] sm:$0xff] %vm479_vm8, %v2548_v11 }
 0x30f   : > { %v991_v34 = vpop.xlane.xlu0 %990 }
 0x310   : > { %v992_v19 = vadd.f32 %v991_v34, %v988_v12 }
 0x312   : > { %993 = vst.msk [vmem:[#allocation3 + $0x8] sm:$0xff] %vm479_vm8, %v992_v19 }
 0x319   : > { %v1084_v45 = vld [vmem:[#allocation3 + $0x8] sm:$0xff] }
 0x31a   : > { %1993 = vrcp.f32 %v1084_v45 }
 0x31f   : > { %v1611_v42 = vpop.permute.xlu1 %1610 }
 0x320   : > { %v1613_v47 = vsub.f32 %v2486_v32, %v1611_v42  ;;  %v1994_v43 = vpop.eup %1993  ;;  %v1074_v54 = vpop.f32.mrf.mxu3  ;;  %v770_v32 = vld [vmem:[#allocation3] sm:$0xff] }
 0x321   : > { %1089 = vperm.xlu1 %1983, %v1994_v43  }
 0x322   : > { %v1614_v35 = vmul.f32 1.442695, %v1613_v47  ;;  %v999_v48 = vpop.permute.xlu0 %998 }
 0x323   : > { %v1001_v3 = vmul.f32 %v999_v48, %v995_v49  ;;  %v1302_v49 = vld [vmem:[#allocation3 + $0x10] sm:$0xff] }
 0x324   : > { %1995 = vpow2.f32 %v1614_v35 }
 0x325   : > { %v1078_v14 = vadd.f32 %v1074_v54, %v1001_v3  ;;  %1997 = vrcp.f32 %v770_v32  ;;  %v1291_v54 = vmul.f32 1.442695, %v1290_v7 }
 0x326   : > { %1999 = vpow2.f32 %v1606_v27 }
 0x327   : > { %1079 = vst.msk [vmem:[#allocation4 + $0x8] sm:$0xff] %vm488_vm7, %v1078_v14 }
 0x328   : > { %v1076_v4 = vpop.f32.mrf.mxu3 }
 0x329   : > { %1295 = vperm.xlu1 %1983, %v2548_v11  }
 0x32a   : > { %v1996_v41 = vpop.eup %1995 }
 0x32b   : > { %v1619_v59 = vsel %vm488_vm7, %v1996_v41, 0.0  ;;  %v1632_v60 = vpack.c.bf16 %v1996_v41, %v1996_v41  ;;  %v1998_v52 = vpop.eup %1997 }
 0x32c   : > { %1620 = vadd.xlane.f32.xlu2 %v1619_v59  ;;  %v2000_v10 = vpop.eup %1999 }
 0x32d   : > { %1933 = vmatmul.msk.bf16.vlgmr.msrb.gmra.mxu2 %vm488_vm7, %v1632_v60  ;;  %v1618_v12 = vmul.f32 %v2000_v10, %v1617_v25 }
 0x32e   : > { %v1086_v6 = vld [vmem:[#allocation4 + $0x8] sm:$0xff] }
 0x344   : > { %775 = vperm.xlu2 %1984, %v1998_v52  }
 0x393   : > { %v1090_v5 = vpop.permute.xlu1 %1089 }
 0x394   : > { %v1092_v30 = vmul.f32 %v1090_v5, %v1086_v6 }
 0x396   : > { %1093 = vxpose.xlu0.b32.start.end [1/1] (short) (narrow) %v1092_v30, 8 }
 0x39b   : > { %v1296_v45 = vpop.permute.xlu1 %1295 }
 0x39c   : > { %v1298_v42 = vsub.f32 %v2510_v40, %v1296_v45 }
 0x39e   : > { %v1299_v47 = vmul.f32 1.442695, %v1298_v42 }
 0x39f   : > { %v1621_v34 = vpop.xlane.xlu2 %1620 }
 0x3a0   : > { %v1622_v19 = vadd.f32 %v1621_v34, %v1618_v12  ;;  %2001 = vpow2.f32 %v1299_v47 }
 0x3a1   : > { %2003 = vpow2.f32 %v1291_v54 }
 0x3a2   : > { %1623 = vst.msk [vmem:[#allocation3 + $0x18] sm:$0xff] %vm479_vm8, %v1622_v19 }
 0x3a6   : > { %v2002_v35 = vpop.eup %2001 }
 0x3a7   : > { %v1304_v0 = vsel %vm488_vm7, %v2002_v35, 0.0  ;;  %v1317_v50 = vpack.c.bf16 %v2002_v35, %v2002_v35  ;;  %v2004_v40 = vpop.eup %2003  ;;  %v776_v52 = vpop.permute.xlu2 %775 }
 0x3a8   : > { %1305 = vadd.xlane.f32.xlu1 %v1304_v0  ;;  %v1303_v48 = vmul.f32 %v2004_v40, %v1302_v49  ;;  %v778_v57 = vmul.f32 %v776_v52, %v772_v20 }
 0x3a9   : > { %1930 = vmatmul.msk.bf16.vlgmr.msrb.gmra.mxu3 %vm488_vm7, %v1317_v50  ;;  %v1714_v59 = vld [vmem:[#allocation3 + $0x18] sm:$0xff] }
 0x3b0   : > { %v1704_v51 = vpop.f32.mrf.mxu2 }
 0x3b8   : > { %v1706_v43 = vpop.f32.mrf.mxu2 }
 0x404   : > { %1313 = vperm.xlu0 %1982, %v2004_v40  }
 0x41b   : > { %v1306_v3 = vpop.xlane.xlu1 %1305 }
 0x41c   : > { %v1307_v41 = vadd.f32 %v1306_v3, %v1303_v48 }
 0x41e   : > { %1308 = vst.msk [vmem:[#allocation3 + $0x10] sm:$0xff] %vm479_vm8, %v1307_v41 }
 0x425   : > { %v1399_v14 = vld [vmem:[#allocation3 + $0x10] sm:$0xff] }
 0x426   : > { %2005 = vrcp.f32 %v1399_v14 }
 0x427   : > { %2007 = vrcp.f32 %v1714_v59 }
 0x42c   : > { %v2006_v60 = vpop.eup %2005  ;;  %v1389_v4 = vpop.f32.mrf.mxu3 }
 0x42d   : > { %1404 = vperm.xlu2 %1984, %v2006_v60   ;;  %v2008_v31 = vpop.eup %2007 }
 0x434   : > { %v1391_v11 = vpop.f32.mrf.mxu3 }
 0x435   : > { %1719 = vperm.xlu2 %1984, %v2008_v31  }
 0x43a   : > { %v1109_v7 = vpop.trf.xlu0 }
 0x43b   : > { %v1125_v32 = vpack.c.bf16 %v1109_v7, %v1109_v7 }
 0x43d   : > { %1928 = vst.msk [vmem:[%s2592_s30 + $0x4] sm:$0xf] %vm812_vm10, %v1125_v32 }
 0x45b   : > { %779 = vxpose.xlu2.b32.start.end [1/1] (short) (narrow) %v778_v57, 8 }
 0x476   : > { %v1314_v56 = vpop.permute.xlu0 %1313 }
 0x477   : > { %v1316_v8 = vmul.f32 %v1314_v56, %v1310_v55 }
 0x479   : > { %v1393_v46 = vadd.f32 %v1389_v4, %v1316_v8 }
 0x47b   : > { %1394 = vst.msk [vmem:[#allocation4 + $0x10] sm:$0xff] %vm488_vm7, %v1393_v46 }
 0x482   : > { %v1401_v53 = vld [vmem:[#allocation4 + $0x10] sm:$0xff] }
 0x487   : > { %v1405_v58 = vpop.permute.xlu2 %1404 }
 0x488   : > { %v1407_v9 = vmul.f32 %v1405_v58, %v1401_v53 }
 0x48a   : > { %1408 = vxpose.xlu1.b32.start.end [1/1] (short) (narrow) %v1407_v9, 8 }
 0x48f   : > { %v1720_v63 = vpop.permute.xlu2 %1719 }
 0x4e4   : > { %1628 = vperm.xlu1 %1983, %v2000_v10  }
 0x4f4   : > { %v795_v18 = vpop.trf.xlu2 }
 0x4f5   : > { %v811_v24 = vpack.c.bf16 %v795_v18, %v795_v18 }
 0x4f7   : > { %813 = vst.msk [vmem:[%s2592_s30] sm:$0xf] %vm812_vm10, %v811_v24 }
 0x52e   : > { %v1424_v21 = vpop.trf.xlu1 }
 0x52f   : > { %v1440_v13 = vpack.c.bf16 %v1424_v21, %v1424_v21 }
 0x531   : > { %1931 = vst.msk [vmem:[%s2592_s30 + $0x8] sm:$0xf] %vm812_vm10, %v1440_v13 }
 0x556   : > { %v1629_v28 = vpop.permute.xlu1 %1628 }
 0x557   : > { %v1631_v38 = vmul.f32 %v1629_v28, %v1625_v39 }
 0x559   : > { %v1708_v37 = vadd.f32 %v1704_v51, %v1631_v38 }
 0x55b   : > { %1709 = vst.msk [vmem:[#allocation4 + $0x18] sm:$0xff] %vm488_vm7, %v1708_v37 }
 0x562   : > { %v1716_v36 = vld [vmem:[#allocation4 + $0x18] sm:$0xff] }
 0x563   : > { %v1722_v61 = vmul.f32 %v1720_v63, %v1716_v36 }
 0x565   : > { %1723 = vxpose.xlu2.b32.start.end [1/1] (short) (narrow) %v1722_v61, 8 }
 0x5fe   : > { %v1739_v62 = vpop.trf.xlu2 }
 0x5ff   : > { %v1755_v44 = vpack.c.bf16 %v1739_v62, %v1739_v62 }
 0x601   : > { %1934 = vst.msk [vmem:[%s2592_s30 + $0xc] sm:$0xf] %vm812_vm10, %v1755_v44 }
 0x602 PF: > { %s13_s16 = sadd.s32 1, %s2047_s16   ;;  %s2640_s12 = smov %s2035_s13 }
 0x603   : > { %p10_p10 = scmp.ge.s32.totalorder %s13_s16, 4   ;;  %s2641_s13 = smov %s2111_s21 }
 0x604   : > { %s2642_s14 = smov %s2043_s15  ;;  %s2643_s15 = smov %s2645_s17 }
 0x605   :  { %12 = sbr.rel (!%p10_p10) target bundleno = 3 (0x3), region = 250 }

</bundles_post_ra>
